<compile_context>
chip_gen: v5e
topology: v5e:2x2
jax: 0.10.0
libtpu: 0.0.40
codegen_flags: <defaults>
</compile_context>

<pallas_src>
import functools

import jax
import jax.numpy as jnp
from jax import lax
from jax.experimental import pallas as pl
from jax.experimental.pallas import tpu as pltpu

HIDDEN_SIZE = 32   # stands in for the module's `Hidden_size` global
INPUT_SIZE = 2     # embedding vocabulary size (nn.Embedding(input_size=2, ...))
LANE = 128         # TPU lane width; hidden is padded to a multiple of this


def _round_up(x, m):
    return (x + m - 1) // m * m


# --------------------------------------------------------------------------
# Kernel: the whole token sequence in one grid step.  Weights resident in VMEM,
# hidden state carried through the fori_loop, outputs written to one VMEM block.
# --------------------------------------------------------------------------
def gru_seq_kernel(toks_ref,     # SMEM scalar prefetch: (T,) int32 token ids
                   gi_ref,       # (V, 1, 3Hp) per-token input-gate table (resident)
                   h0_ref,       # (1, Hp) initial hidden (resident)
                   whh_ref,      # (Hp, 3Hp) = padded weight_hh_l0^T (resident)
                   bhh_ref,      # (1, 3Hp) padded b_hh (resident)
                   out_ref,      # (T, Hp) per-step hidden outputs (single block)
                   *, seq_len, unroll):
    Hp = whh_ref.shape[0]
    whh = whh_ref[...]           # hoist resident weight / bias loads out of the loop
    bhh = bhh_ref[...]

    def step(t, h):
        tok = toks_ref[t]                        # scalar read from SMEM
        gi = gi_ref[tok]                         # (1, 3Hp) gather: x@W_ih^T + b_ih
        gh = jnp.dot(h, whh, preferred_element_type=jnp.float32) + bhh
        # torch gate order r, z, n; gate blocks are Hp-aligned (vreg-aligned).
        r = jax.nn.sigmoid(gi[:, 0:Hp] + gh[:, 0:Hp])
        z = jax.nn.sigmoid(gi[:, Hp:2 * Hp] + gh[:, Hp:2 * Hp])
        n = jnp.tanh(gi[:, 2 * Hp:3 * Hp] + r * gh[:, 2 * Hp:3 * Hp])
        h_new = (1.0 - z) * n + z * h
        out_ref[pl.ds(t, 1), :] = h_new          # store this step's hidden
        return h_new

    lax.fori_loop(0, seq_len, step, h0_ref[...], unroll=unroll)


# --------------------------------------------------------------------------
# One-time parameter prep (hoisted out of the forward path):
#  * fold embedding + W_ih + b_ih into a per-token gate table (vocab is tiny),
#  * transpose W_hh, pad every gate block to Hp lanes, pack biases.
# --------------------------------------------------------------------------
def prepare_params(params, hidden_size=HIDDEN_SIZE):
    emb, w_ih, w_hh, b_ih, b_hh = params
    H = hidden_size
    Hp = _round_up(H, LANE)
    V = emb.shape[0]

    # Per-token input-gate contributions: gi_full[v] = emb[v] @ W_ih^T + b_ih.
    gi_full = emb.astype(jnp.float32) @ w_ih.astype(jnp.float32).T + b_ih.astype(jnp.float32)
    gi_tab = jnp.zeros((V, 1, 3 * Hp), jnp.float32)
    for g in range(3):
        gi_tab = gi_tab.at[:, 0, g * Hp:g * Hp + H].set(gi_full[:, g * H:(g + 1) * H])

    # W_hh: torch layout (3H, H) -> padded W^T (Hp, 3Hp), gate blocks Hp apart.
    whh_t = w_hh.astype(jnp.float32).T                       # (H, 3H), gate order r|z|n
    whh_p = jnp.zeros((Hp, 3 * Hp), jnp.float32)
    for g in range(3):
        whh_p = whh_p.at[:H, g * Hp:g * Hp + H].set(whh_t[:, g * H:(g + 1) * H])

    bhh_p = jnp.zeros((1, 3 * Hp), jnp.float32)
    for g in range(3):
        bhh_p = bhh_p.at[0, g * Hp:g * Hp + H].set(b_hh[g * H:(g + 1) * H].astype(jnp.float32))

    return gi_tab, whh_p, bhh_p


# --------------------------------------------------------------------------
# Fused multi-step forward: one pallas_call, one grid step, whole sequence.
# --------------------------------------------------------------------------
def encoder_rnn_forward_seq(tokens, hidden0, prepped, hidden_size=HIDDEN_SIZE):
    """tokens: (T,) int ids; hidden0: (1,1,H).
    Returns (outputs (T,1,1,H), hidden (1,1,H)) == T applications of module.forward."""
    gi_tab, whh_p, bhh_p = prepped
    Hp = whh_p.shape[0]
    V = gi_tab.shape[0]
    tokens = jnp.asarray(tokens, jnp.int32).reshape(-1)
    T = int(tokens.shape[0])

    h0 = jnp.zeros((1, Hp), jnp.float32).at[:, :hidden_size].set(
        hidden0.reshape(1, hidden_size).astype(jnp.float32))

    grid_spec = pltpu.PrefetchScalarGridSpec(
        num_scalar_prefetch=1,
        grid=(1,),
        in_specs=[
            pl.BlockSpec((V, 1, 3 * Hp), lambda i, toks: (0, 0, 0)),  # gate table (resident)
            pl.BlockSpec((1, Hp),        lambda i, toks: (0, 0)),     # h0         (resident)
            pl.BlockSpec((Hp, 3 * Hp),   lambda i, toks: (0, 0)),     # W_hh^T     (resident)
            pl.BlockSpec((1, 3 * Hp),    lambda i, toks: (0, 0)),     # b_hh       (resident)
        ],
        out_specs=pl.BlockSpec((T, Hp), lambda i, toks: (0, 0)),      # whole sequence, one block
    )

    kernel = functools.partial(gru_seq_kernel, seq_len=T, unroll=(T <= 16))

    outs = pl.pallas_call(
        kernel,
        out_shape=jax.ShapeDtypeStruct((T, Hp), jnp.float32),
        grid_spec=grid_spec,
        compiler_params=pltpu.CompilerParams(
            dimension_semantics=("arbitrary",)),   # time is a recurrence
    )(tokens, gi_tab, h0, whh_p, bhh_p)

    outputs = outs[:, :hidden_size].reshape(T, 1, 1, hidden_size)
    hidden = outputs[-1]                           # final hidden == last output
    return outputs, hidden
    # TODO(synk): for a real batch of independent sequences, add a leading
    # "parallel" grid axis (batch) to shard across v7x's two TensorCores; for
    # very long sequences, chunk T across an "arbitrary" grid axis with the
    # hidden carried in a VMEM scratch.


def encoder_rnn_forward(token_idx, hidden, prepped, hidden_size=HIDDEN_SIZE):
    """Single-step API matching EncoderRNN.forward: returns (output, hidden), each (1,1,H)."""
    outputs, h_new = encoder_rnn_forward_seq(
        jnp.asarray(token_idx, jnp.int32).reshape(1), hidden, prepped, hidden_size)
    return outputs[0], h_new


# --------------------------------------------------------------------------
# Raw (torch-layout) parameters + pure-JAX reference.
# --------------------------------------------------------------------------
def init_params(key, hidden_size=HIDDEN_SIZE, input_size=INPUT_SIZE):
    k_emb, k_wih, k_whh, k_bih, k_bhh = jax.random.split(key, 5)
    bound = 1.0 / jnp.sqrt(jnp.float32(hidden_size))
    emb_table = jax.random.normal(k_emb, (input_size, hidden_size), jnp.float32)
    w_ih = jax.random.uniform(k_wih, (3 * hidden_size, hidden_size), jnp.float32, -bound, bound)
    w_hh = jax.random.uniform(k_whh, (3 * hidden_size, hidden_size), jnp.float32, -bound, bound)
    b_ih = jax.random.uniform(k_bih, (3 * hidden_size,), jnp.float32, -bound, bound)
    b_hh = jax.random.uniform(k_bhh, (3 * hidden_size,), jnp.float32, -bound, bound)
    return emb_table, w_ih, w_hh, b_ih, b_hh


def gru_step_reference(tok, h, params):
    emb, w_ih, w_hh, b_ih, b_hh = params
    H = h.shape[-1]
    x = emb[tok].reshape(1, H)
    gi = x @ w_ih.T + b_ih
    gh = h @ w_hh.T + b_hh
    r = jax.nn.sigmoid(gi[:, :H] + gh[:, :H])
    z = jax.nn.sigmoid(gi[:, H:2 * H] + gh[:, H:2 * H])
    n = jnp.tanh(gi[:, 2 * H:] + r * gh[:, 2 * H:])
    return (1.0 - z) * n + z * h


def encoder_rnn_reference_seq(tokens, hidden0, params):
    H = hidden0.shape[-1]
    h = hidden0.reshape(1, H)
    outs = []
    for tok in list(tokens):
        h = gru_step_reference(int(tok), h, params)
        outs.append(h.reshape(1, 1, H))
    return jnp.stack(outs, 0), outs[-1]


if __name__ == "__main__":
    key = jax.random.PRNGKey(0)
    raw_params = init_params(key)
    prepped = prepare_params(raw_params)          # one-time prep (hoisted transposes / folds)

    T = 8
    tokens = jax.random.randint(jax.random.PRNGKey(1), (T,), 0, INPUT_SIZE, jnp.int32)
    hidden0 = jnp.zeros((1, 1, HIDDEN_SIZE), jnp.float32)   # initHidden()

    # Fused multi-step encoder: one pallas_call, one grid step for the whole sequence.
    outputs, hidden = encoder_rnn_forward_seq(tokens, hidden0, prepped)
    outputs = jax.block_until_ready(outputs)
    hidden = jax.block_until_ready(hidden)

    ref_outputs, ref_hidden = encoder_rnn_reference_seq(tokens, hidden0, raw_params)
    assert outputs.shape == (T, 1, 1, HIDDEN_SIZE)
    assert hidden.shape == (1, 1, HIDDEN_SIZE)
    assert jnp.allclose(outputs, ref_outputs, atol=1e-4, rtol=1e-3), "seq outputs mismatch"
    assert jnp.allclose(hidden, ref_hidden, atol=1e-4, rtol=1e-3), "seq hidden mismatch"

    # Single-step call (exact module.forward semantics).
    out1, h1 = encoder_rnn_forward(tokens[0], hidden0, prepped)
    out1 = jax.block_until_ready(out1)
    h1 = jax.block_until_ready(h1)
    ref_h1 = gru_step_reference(int(tokens[0]), hidden0.reshape(1, HIDDEN_SIZE), raw_params)
    assert out1.shape == (1, 1, HIDDEN_SIZE) and h1.shape == (1, 1, HIDDEN_SIZE)
    assert jnp.allclose(out1.reshape(1, HIDDEN_SIZE), ref_h1, atol=1e-4, rtol=1e-3)
    assert jnp.allclose(h1.reshape(1, HIDDEN_SIZE), ref_h1, atol=1e-4, rtol=1e-3)

    print("KERNEL_OK")
</pallas_src>

<mosaic_0001>
module attributes {stable_mosaic.version = 11 : i64} {
  func.func @gru_seq_kernel(%arg0: i32, %arg1: memref<8xi32, #tpu.memory_space<smem>>, %arg2: memref<2x1x384xf32, #tpu.memory_space<vmem>>, %arg3: memref<1x128xf32, #tpu.memory_space<vmem>>, %arg4: memref<128x384xf32, #tpu.memory_space<vmem>>, %arg5: memref<1x384xf32, #tpu.memory_space<vmem>>, %arg6: memref<8x128xf32, #tpu.memory_space<vmem>>) attributes {dimension_semantics = [#tpu.dimension_semantics<arbitrary>], iteration_bounds = array<i64: 1>, scalar_prefetch = 1 : i64, scratch_operands = 0 : i64, tpu.core_type = #tpu.core_type<tc>, window_params = [{pipeline_mode = #tpu.pipeline_mode<synchronous>, transform_indices = @transform_0, window_bounds = array<i64: 2, 1, 384>}, {pipeline_mode = #tpu.pipeline_mode<synchronous>, transform_indices = @transform_1, window_bounds = array<i64: 1, 128>}, {pipeline_mode = #tpu.pipeline_mode<synchronous>, transform_indices = @transform_2, window_bounds = array<i64: 128, 384>}, {pipeline_mode = #tpu.pipeline_mode<synchronous>, transform_indices = @transform_3, window_bounds = array<i64: 1, 384>}, {pipeline_mode = #tpu.pipeline_mode<synchronous>, transform_indices = @transform_4, window_bounds = array<i64: 8, 128>}]} {
    %c0 = arith.constant 0 : index
    %c0_0 = arith.constant 0 : index
    %0 = vector.load %arg4[%c0, %c0_0] : memref<128x384xf32, #tpu.memory_space<vmem>>, vector<128x384xf32>
    %c0_1 = arith.constant 0 : index
    %c0_2 = arith.constant 0 : index
    %1 = vector.load %arg5[%c0_1, %c0_2] : memref<1x384xf32, #tpu.memory_space<vmem>>, vector<1x384xf32>
    %c0_3 = arith.constant 0 : index
    %c0_4 = arith.constant 0 : index
    %2 = vector.load %arg3[%c0_3, %c0_4] : memref<1x128xf32, #tpu.memory_space<vmem>>, vector<1x128xf32>
    %c0_i32 = arith.constant 0 : i32
    %3 = arith.index_cast %c0_i32 : i32 to index
    %4 = memref.load %arg1[%3] : memref<8xi32, #tpu.memory_space<smem>>
    %5 = arith.index_cast %4 : i32 to index
    %c0_5 = arith.constant 0 : index
    %c0_6 = arith.constant 0 : index
    %6 = vector.load %arg2[%5, %c0_5, %c0_6] : memref<2x1x384xf32, #tpu.memory_space<vmem>>, vector<1x1x384xf32>
    %7 = vector.shape_cast %6 : vector<1x1x384xf32> to vector<1x384xf32>
    %cst = arith.constant dense<0.000000e+00> : vector<1x384xf32>
    %8 = tpu.matmul %2, %0, %cst {dimension_numbers = #tpu.dot_dimension_numbers<[1], [0], [0], [1], [0, 0, 1, 1], [], []>} : vector<1x128xf32>, vector<128x384xf32>, vector<1x384xf32> -> vector<1x384xf32>
    %9 = arith.addf %8, %1 : vector<1x384xf32>
    %10 = vector.extract_strided_slice %7 {offsets = [0, 0], sizes = [1, 128], strides = [1, 1]} : vector<1x384xf32> to vector<1x128xf32>
    %11 = vector.extract_strided_slice %9 {offsets = [0, 0], sizes = [1, 128], strides = [1, 1]} : vector<1x384xf32> to vector<1x128xf32>
    %12 = arith.addf %10, %11 : vector<1x128xf32>
    %13 = arith.negf %12 : vector<1x128xf32>
    %14 = math.exp %13 : vector<1x128xf32>
    %cst_7 = arith.constant 1.000000e+00 : f32
    %15 = vector.broadcast %cst_7 : f32 to vector<1x128xf32>
    %16 = arith.addf %15, %14 : vector<1x128xf32>
    %17 = arith.divf %15, %16 : vector<1x128xf32>
    %18 = vector.extract_strided_slice %7 {offsets = [0, 128], sizes = [1, 128], strides = [1, 1]} : vector<1x384xf32> to vector<1x128xf32>
    %19 = vector.extract_strided_slice %9 {offsets = [0, 128], sizes = [1, 128], strides = [1, 1]} : vector<1x384xf32> to vector<1x128xf32>
    %20 = arith.addf %18, %19 : vector<1x128xf32>
    %21 = arith.negf %20 : vector<1x128xf32>
    %22 = math.exp %21 : vector<1x128xf32>
    %cst_8 = arith.constant 1.000000e+00 : f32
    %23 = vector.broadcast %cst_8 : f32 to vector<1x128xf32>
    %24 = arith.addf %23, %22 : vector<1x128xf32>
    %25 = arith.divf %23, %24 : vector<1x128xf32>
    %26 = vector.extract_strided_slice %7 {offsets = [0, 256], sizes = [1, 128], strides = [1, 1]} : vector<1x384xf32> to vector<1x128xf32>
    %27 = vector.extract_strided_slice %9 {offsets = [0, 256], sizes = [1, 128], strides = [1, 1]} : vector<1x384xf32> to vector<1x128xf32>
    %28 = arith.mulf %17, %27 : vector<1x128xf32>
    %29 = arith.addf %26, %28 : vector<1x128xf32>
    %30 = math.tanh %29 : vector<1x128xf32>
    %cst_9 = arith.constant 1.000000e+00 : f32
    %31 = vector.broadcast %cst_9 : f32 to vector<1x128xf32>
    %32 = arith.subf %31, %25 : vector<1x128xf32>
    %33 = arith.mulf %32, %30 : vector<1x128xf32>
    %34 = arith.mulf %25, %2 : vector<1x128xf32>
    %35 = arith.addf %33, %34 : vector<1x128xf32>
    %36 = arith.index_cast %c0_i32 : i32 to index
    %c0_10 = arith.constant 0 : index
    %37 = vector.load %arg6[%36, %c0_10] : memref<8x128xf32, #tpu.memory_space<vmem>>, vector<1x128xf32>
    tpu.vector_store %arg6[%36, %c0_10], %35 {strides = array<i32>} : memref<8x128xf32, #tpu.memory_space<vmem>>, vector<1x128xf32>,
    %c1_i32 = arith.constant 1 : i32
    %38 = arith.index_cast %c1_i32 : i32 to index
    %39 = memref.load %arg1[%38] : memref<8xi32, #tpu.memory_space<smem>>
    %40 = arith.index_cast %39 : i32 to index
    %c0_11 = arith.constant 0 : index
    %c0_12 = arith.constant 0 : index
    %41 = vector.load %arg2[%40, %c0_11, %c0_12] : memref<2x1x384xf32, #tpu.memory_space<vmem>>, vector<1x1x384xf32>
    %42 = vector.shape_cast %41 : vector<1x1x384xf32> to vector<1x384xf32>
    %cst_13 = arith.constant dense<0.000000e+00> : vector<1x384xf32>
    %43 = tpu.matmul %35, %0, %cst_13 {dimension_numbers = #tpu.dot_dimension_numbers<[1], [0], [0], [1], [0, 0, 1, 1], [], []>} : vector<1x128xf32>, vector<128x384xf32>, vector<1x384xf32> -> vector<1x384xf32>
    %44 = arith.addf %43, %1 : vector<1x384xf32>
    %45 = vector.extract_strided_slice %42 {offsets = [0, 0], sizes = [1, 128], strides = [1, 1]} : vector<1x384xf32> to vector<1x128xf32>
    %46 = vector.extract_strided_slice %44 {offsets = [0, 0], sizes = [1, 128], strides = [1, 1]} : vector<1x384xf32> to vector<1x128xf32>
    %47 = arith.addf %45, %46 : vector<1x128xf32>
    %48 = arith.negf %47 : vector<1x128xf32>
    %49 = math.exp %48 : vector<1x128xf32>
    %cst_14 = arith.constant 1.000000e+00 : f32
    %50 = vector.broadcast %cst_14 : f32 to vector<1x128xf32>
    %51 = arith.addf %50, %49 : vector<1x128xf32>
    %52 = arith.divf %50, %51 : vector<1x128xf32>
    %53 = vector.extract_strided_slice %42 {offsets = [0, 128], sizes = [1, 128], strides = [1, 1]} : vector<1x384xf32> to vector<1x128xf32>
    %54 = vector.extract_strided_slice %44 {offsets = [0, 128], sizes = [1, 128], strides = [1, 1]} : vector<1x384xf32> to vector<1x128xf32>
    %55 = arith.addf %53, %54 : vector<1x128xf32>
    %56 = arith.negf %55 : vector<1x128xf32>
    %57 = math.exp %56 : vector<1x128xf32>
    %cst_15 = arith.constant 1.000000e+00 : f32
    %58 = vector.broadcast %cst_15 : f32 to vector<1x128xf32>
    %59 = arith.addf %58, %57 : vector<1x128xf32>
    %60 = arith.divf %58, %59 : vector<1x128xf32>
    %61 = vector.extract_strided_slice %42 {offsets = [0, 256], sizes = [1, 128], strides = [1, 1]} : vector<1x384xf32> to vector<1x128xf32>
    %62 = vector.extract_strided_slice %44 {offsets = [0, 256], sizes = [1, 128], strides = [1, 1]} : vector<1x384xf32> to vector<1x128xf32>
    %63 = arith.mulf %52, %62 : vector<1x128xf32>
    %64 = arith.addf %61, %63 : vector<1x128xf32>
    %65 = math.tanh %64 : vector<1x128xf32>
    %cst_16 = arith.constant 1.000000e+00 : f32
    %66 = vector.broadcast %cst_16 : f32 to vector<1x128xf32>
    %67 = arith.subf %66, %60 : vector<1x128xf32>
    %68 = arith.mulf %67, %65 : vector<1x128xf32>
    %69 = arith.mulf %60, %35 : vector<1x128xf32>
    %70 = arith.addf %68, %69 : vector<1x128xf32>
    %71 = arith.index_cast %c1_i32 : i32 to index
    %c0_17 = arith.constant 0 : index
    %72 = vector.load %arg6[%71, %c0_17] : memref<8x128xf32, #tpu.memory_space<vmem>>, vector<1x128xf32>
    tpu.vector_store %arg6[%71, %c0_17], %70 {strides = array<i32>} : memref<8x128xf32, #tpu.memory_space<vmem>>, vector<1x128xf32>,
    %c2_i32 = arith.constant 2 : i32
    %73 = arith.index_cast %c2_i32 : i32 to index
    %74 = memref.load %arg1[%73] : memref<8xi32, #tpu.memory_space<smem>>
    %75 = arith.index_cast %74 : i32 to index
    %c0_18 = arith.constant 0 : index
    %c0_19 = arith.constant 0 : index
    %76 = vector.load %arg2[%75, %c0_18, %c0_19] : memref<2x1x384xf32, #tpu.memory_space<vmem>>, vector<1x1x384xf32>
    %77 = vector.shape_cast %76 : vector<1x1x384xf32> to vector<1x384xf32>
    %cst_20 = arith.constant dense<0.000000e+00> : vector<1x384xf32>
    %78 = tpu.matmul %70, %0, %cst_20 {dimension_numbers = #tpu.dot_dimension_numbers<[1], [0], [0], [1], [0, 0, 1, 1], [], []>} : vector<1x128xf32>, vector<128x384xf32>, vector<1x384xf32> -> vector<1x384xf32>
    %79 = arith.addf %78, %1 : vector<1x384xf32>
    %80 = vector.extract_strided_slice %77 {offsets = [0, 0], sizes = [1, 128], strides = [1, 1]} : vector<1x384xf32> to vector<1x128xf32>
    %81 = vector.extract_strided_slice %79 {offsets = [0, 0], sizes = [1, 128], strides = [1, 1]} : vector<1x384xf32> to vector<1x128xf32>
    %82 = arith.addf %80, %81 : vector<1x128xf32>
    %83 = arith.negf %82 : vector<1x128xf32>
    %84 = math.exp %83 : vector<1x128xf32>
    %cst_21 = arith.constant 1.000000e+00 : f32
    %85 = vector.broadcast %cst_21 : f32 to vector<1x128xf32>
    %86 = arith.addf %85, %84 : vector<1x128xf32>
    %87 = arith.divf %85, %86 : vector<1x128xf32>
    %88 = vector.extract_strided_slice %77 {offsets = [0, 128], sizes = [1, 128], strides = [1, 1]} : vector<1x384xf32> to vector<1x128xf32>
    %89 = vector.extract_strided_slice %79 {offsets = [0, 128], sizes = [1, 128], strides = [1, 1]} : vector<1x384xf32> to vector<1x128xf32>
    %90 = arith.addf %88, %89 : vector<1x128xf32>
    %91 = arith.negf %90 : vector<1x128xf32>
    %92 = math.exp %91 : vector<1x128xf32>
    %cst_22 = arith.constant 1.000000e+00 : f32
    %93 = vector.broadcast %cst_22 : f32 to vector<1x128xf32>
    %94 = arith.addf %93, %92 : vector<1x128xf32>
    %95 = arith.divf %93, %94 : vector<1x128xf32>
    %96 = vector.extract_strided_slice %77 {offsets = [0, 256], sizes = [1, 128], strides = [1, 1]} : vector<1x384xf32> to vector<1x128xf32>
    %97 = vector.extract_strided_slice %79 {offsets = [0, 256], sizes = [1, 128], strides = [1, 1]} : vector<1x384xf32> to vector<1x128xf32>
    %98 = arith.mulf %87, %97 : vector<1x128xf32>
    %99 = arith.addf %96, %98 : vector<1x128xf32>
    %100 = math.tanh %99 : vector<1x128xf32>
    %cst_23 = arith.constant 1.000000e+00 : f32
    %101 = vector.broadcast %cst_23 : f32 to vector<1x128xf32>
    %102 = arith.subf %101, %95 : vector<1x128xf32>
    %103 = arith.mulf %102, %100 : vector<1x128xf32>
    %104 = arith.mulf %95, %70 : vector<1x128xf32>
    %105 = arith.addf %103, %104 : vector<1x128xf32>
    %106 = arith.index_cast %c2_i32 : i32 to index
    %c0_24 = arith.constant 0 : index
    %107 = vector.load %arg6[%106, %c0_24] : memref<8x128xf32, #tpu.memory_space<vmem>>, vector<1x128xf32>
    tpu.vector_store %arg6[%106, %c0_24], %105 {strides = array<i32>} : memref<8x128xf32, #tpu.memory_space<vmem>>, vector<1x128xf32>,
    %c3_i32 = arith.constant 3 : i32
    %108 = arith.index_cast %c3_i32 : i32 to index
    %109 = memref.load %arg1[%108] : memref<8xi32, #tpu.memory_space<smem>>
    %110 = arith.index_cast %109 : i32 to index
    %c0_25 = arith.constant 0 : index
    %c0_26 = arith.constant 0 : index
    %111 = vector.load %arg2[%110, %c0_25, %c0_26] : memref<2x1x384xf32, #tpu.memory_space<vmem>>, vector<1x1x384xf32>
    %112 = vector.shape_cast %111 : vector<1x1x384xf32> to vector<1x384xf32>
    %cst_27 = arith.constant dense<0.000000e+00> : vector<1x384xf32>
    %113 = tpu.matmul %105, %0, %cst_27 {dimension_numbers = #tpu.dot_dimension_numbers<[1], [0], [0], [1], [0, 0, 1, 1], [], []>} : vector<1x128xf32>, vector<128x384xf32>, vector<1x384xf32> -> vector<1x384xf32>
    %114 = arith.addf %113, %1 : vector<1x384xf32>
    %115 = vector.extract_strided_slice %112 {offsets = [0, 0], sizes = [1, 128], strides = [1, 1]} : vector<1x384xf32> to vector<1x128xf32>
    %116 = vector.extract_strided_slice %114 {offsets = [0, 0], sizes = [1, 128], strides = [1, 1]} : vector<1x384xf32> to vector<1x128xf32>
    %117 = arith.addf %115, %116 : vector<1x128xf32>
    %118 = arith.negf %117 : vector<1x128xf32>
    %119 = math.exp %118 : vector<1x128xf32>
    %cst_28 = arith.constant 1.000000e+00 : f32
    %120 = vector.broadcast %cst_28 : f32 to vector<1x128xf32>
    %121 = arith.addf %120, %119 : vector<1x128xf32>
    %122 = arith.divf %120, %121 : vector<1x128xf32>
    %123 = vector.extract_strided_slice %112 {offsets = [0, 128], sizes = [1, 128], strides = [1, 1]} : vector<1x384xf32> to vector<1x128xf32>
    %124 = vector.extract_strided_slice %114 {offsets = [0, 128], sizes = [1, 128], strides = [1, 1]} : vector<1x384xf32> to vector<1x128xf32>
    %125 = arith.addf %123, %124 : vector<1x128xf32>
    %126 = arith.negf %125 : vector<1x128xf32>
    %127 = math.exp %126 : vector<1x128xf32>
    %cst_29 = arith.constant 1.000000e+00 : f32
    %128 = vector.broadcast %cst_29 : f32 to vector<1x128xf32>
    %129 = arith.addf %128, %127 : vector<1x128xf32>
    %130 = arith.divf %128, %129 : vector<1x128xf32>
    %131 = vector.extract_strided_slice %112 {offsets = [0, 256], sizes = [1, 128], strides = [1, 1]} : vector<1x384xf32> to vector<1x128xf32>
    %132 = vector.extract_strided_slice %114 {offsets = [0, 256], sizes = [1, 128], strides = [1, 1]} : vector<1x384xf32> to vector<1x128xf32>
    %133 = arith.mulf %122, %132 : vector<1x128xf32>
    %134 = arith.addf %131, %133 : vector<1x128xf32>
    %135 = math.tanh %134 : vector<1x128xf32>
    %cst_30 = arith.constant 1.000000e+00 : f32
    %136 = vector.broadcast %cst_30 : f32 to vector<1x128xf32>
    %137 = arith.subf %136, %130 : vector<1x128xf32>
    %138 = arith.mulf %137, %135 : vector<1x128xf32>
    %139 = arith.mulf %130, %105 : vector<1x128xf32>
    %140 = arith.addf %138, %139 : vector<1x128xf32>
    %141 = arith.index_cast %c3_i32 : i32 to index
    %c0_31 = arith.constant 0 : index
    %142 = vector.load %arg6[%141, %c0_31] : memref<8x128xf32, #tpu.memory_space<vmem>>, vector<1x128xf32>
    tpu.vector_store %arg6[%141, %c0_31], %140 {strides = array<i32>} : memref<8x128xf32, #tpu.memory_space<vmem>>, vector<1x128xf32>,
    %c4_i32 = arith.constant 4 : i32
    %143 = arith.index_cast %c4_i32 : i32 to index
    %144 = memref.load %arg1[%143] : memref<8xi32, #tpu.memory_space<smem>>
    %145 = arith.index_cast %144 : i32 to index
    %c0_32 = arith.constant 0 : index
    %c0_33 = arith.constant 0 : index
    %146 = vector.load %arg2[%145, %c0_32, %c0_33] : memref<2x1x384xf32, #tpu.memory_space<vmem>>, vector<1x1x384xf32>
    %147 = vector.shape_cast %146 : vector<1x1x384xf32> to vector<1x384xf32>
    %cst_34 = arith.constant dense<0.000000e+00> : vector<1x384xf32>
    %148 = tpu.matmul %140, %0, %cst_34 {dimension_numbers = #tpu.dot_dimension_numbers<[1], [0], [0], [1], [0, 0, 1, 1], [], []>} : vector<1x128xf32>, vector<128x384xf32>, vector<1x384xf32> -> vector<1x384xf32>
    %149 = arith.addf %148, %1 : vector<1x384xf32>
    %150 = vector.extract_strided_slice %147 {offsets = [0, 0], sizes = [1, 128], strides = [1, 1]} : vector<1x384xf32> to vector<1x128xf32>
    %151 = vector.extract_strided_slice %149 {offsets = [0, 0], sizes = [1, 128], strides = [1, 1]} : vector<1x384xf32> to vector<1x128xf32>
    %152 = arith.addf %150, %151 : vector<1x128xf32>
    %153 = arith.negf %152 : vector<1x128xf32>
    %154 = math.exp %153 : vector<1x128xf32>
    %cst_35 = arith.constant 1.000000e+00 : f32
    %155 = vector.broadcast %cst_35 : f32 to vector<1x128xf32>
    %156 = arith.addf %155, %154 : vector<1x128xf32>
    %157 = arith.divf %155, %156 : vector<1x128xf32>
    %158 = vector.extract_strided_slice %147 {offsets = [0, 128], sizes = [1, 128], strides = [1, 1]} : vector<1x384xf32> to vector<1x128xf32>
    %159 = vector.extract_strided_slice %149 {offsets = [0, 128], sizes = [1, 128], strides = [1, 1]} : vector<1x384xf32> to vector<1x128xf32>
    %160 = arith.addf %158, %159 : vector<1x128xf32>
    %161 = arith.negf %160 : vector<1x128xf32>
    %162 = math.exp %161 : vector<1x128xf32>
    %cst_36 = arith.constant 1.000000e+00 : f32
    %163 = vector.broadcast %cst_36 : f32 to vector<1x128xf32>
    %164 = arith.addf %163, %162 : vector<1x128xf32>
    %165 = arith.divf %163, %164 : vector<1x128xf32>
    %166 = vector.extract_strided_slice %147 {offsets = [0, 256], sizes = [1, 128], strides = [1, 1]} : vector<1x384xf32> to vector<1x128xf32>
    %167 = vector.extract_strided_slice %149 {offsets = [0, 256], sizes = [1, 128], strides = [1, 1]} : vector<1x384xf32> to vector<1x128xf32>
    %168 = arith.mulf %157, %167 : vector<1x128xf32>
    %169 = arith.addf %166, %168 : vector<1x128xf32>
    %170 = math.tanh %169 : vector<1x128xf32>
    %cst_37 = arith.constant 1.000000e+00 : f32
    %171 = vector.broadcast %cst_37 : f32 to vector<1x128xf32>
    %172 = arith.subf %171, %165 : vector<1x128xf32>
    %173 = arith.mulf %172, %170 : vector<1x128xf32>
    %174 = arith.mulf %165, %140 : vector<1x128xf32>
    %175 = arith.addf %173, %174 : vector<1x128xf32>
    %176 = arith.index_cast %c4_i32 : i32 to index
    %c0_38 = arith.constant 0 : index
    %177 = vector.load %arg6[%176, %c0_38] : memref<8x128xf32, #tpu.memory_space<vmem>>, vector<1x128xf32>
    tpu.vector_store %arg6[%176, %c0_38], %175 {strides = array<i32>} : memref<8x128xf32, #tpu.memory_space<vmem>>, vector<1x128xf32>,
    %c5_i32 = arith.constant 5 : i32
    %178 = arith.index_cast %c5_i32 : i32 to index
    %179 = memref.load %arg1[%178] : memref<8xi32, #tpu.memory_space<smem>>
    %180 = arith.index_cast %179 : i32 to index
    %c0_39 = arith.constant 0 : index
    %c0_40 = arith.constant 0 : index
    %181 = vector.load %arg2[%180, %c0_39, %c0_40] : memref<2x1x384xf32, #tpu.memory_space<vmem>>, vector<1x1x384xf32>
    %182 = vector.shape_cast %181 : vector<1x1x384xf32> to vector<1x384xf32>
    %cst_41 = arith.constant dense<0.000000e+00> : vector<1x384xf32>
    %183 = tpu.matmul %175, %0, %cst_41 {dimension_numbers = #tpu.dot_dimension_numbers<[1], [0], [0], [1], [0, 0, 1, 1], [], []>} : vector<1x128xf32>, vector<128x384xf32>, vector<1x384xf32> -> vector<1x384xf32>
    %184 = arith.addf %183, %1 : vector<1x384xf32>
    %185 = vector.extract_strided_slice %182 {offsets = [0, 0], sizes = [1, 128], strides = [1, 1]} : vector<1x384xf32> to vector<1x128xf32>
    %186 = vector.extract_strided_slice %184 {offsets = [0, 0], sizes = [1, 128], strides = [1, 1]} : vector<1x384xf32> to vector<1x128xf32>
    %187 = arith.addf %185, %186 : vector<1x128xf32>
    %188 = arith.negf %187 : vector<1x128xf32>
    %189 = math.exp %188 : vector<1x128xf32>
    %cst_42 = arith.constant 1.000000e+00 : f32
    %190 = vector.broadcast %cst_42 : f32 to vector<1x128xf32>
    %191 = arith.addf %190, %189 : vector<1x128xf32>
    %192 = arith.divf %190, %191 : vector<1x128xf32>
    %193 = vector.extract_strided_slice %182 {offsets = [0, 128], sizes = [1, 128], strides = [1, 1]} : vector<1x384xf32> to vector<1x128xf32>
    %194 = vector.extract_strided_slice %184 {offsets = [0, 128], sizes = [1, 128], strides = [1, 1]} : vector<1x384xf32> to vector<1x128xf32>
    %195 = arith.addf %193, %194 : vector<1x128xf32>
    %196 = arith.negf %195 : vector<1x128xf32>
    %197 = math.exp %196 : vector<1x128xf32>
    %cst_43 = arith.constant 1.000000e+00 : f32
    %198 = vector.broadcast %cst_43 : f32 to vector<1x128xf32>
    %199 = arith.addf %198, %197 : vector<1x128xf32>
    %200 = arith.divf %198, %199 : vector<1x128xf32>
    %201 = vector.extract_strided_slice %182 {offsets = [0, 256], sizes = [1, 128], strides = [1, 1]} : vector<1x384xf32> to vector<1x128xf32>
    %202 = vector.extract_strided_slice %184 {offsets = [0, 256], sizes = [1, 128], strides = [1, 1]} : vector<1x384xf32> to vector<1x128xf32>
    %203 = arith.mulf %192, %202 : vector<1x128xf32>
    %204 = arith.addf %201, %203 : vector<1x128xf32>
    %205 = math.tanh %204 : vector<1x128xf32>
    %cst_44 = arith.constant 1.000000e+00 : f32
    %206 = vector.broadcast %cst_44 : f32 to vector<1x128xf32>
    %207 = arith.subf %206, %200 : vector<1x128xf32>
    %208 = arith.mulf %207, %205 : vector<1x128xf32>
    %209 = arith.mulf %200, %175 : vector<1x128xf32>
    %210 = arith.addf %208, %209 : vector<1x128xf32>
    %211 = arith.index_cast %c5_i32 : i32 to index
    %c0_45 = arith.constant 0 : index
    %212 = vector.load %arg6[%211, %c0_45] : memref<8x128xf32, #tpu.memory_space<vmem>>, vector<1x128xf32>
    tpu.vector_store %arg6[%211, %c0_45], %210 {strides = array<i32>} : memref<8x128xf32, #tpu.memory_space<vmem>>, vector<1x128xf32>,
    %c6_i32 = arith.constant 6 : i32
    %213 = arith.index_cast %c6_i32 : i32 to index
    %214 = memref.load %arg1[%213] : memref<8xi32, #tpu.memory_space<smem>>
    %215 = arith.index_cast %214 : i32 to index
    %c0_46 = arith.constant 0 : index
    %c0_47 = arith.constant 0 : index
    %216 = vector.load %arg2[%215, %c0_46, %c0_47] : memref<2x1x384xf32, #tpu.memory_space<vmem>>, vector<1x1x384xf32>
    %217 = vector.shape_cast %216 : vector<1x1x384xf32> to vector<1x384xf32>
    %cst_48 = arith.constant dense<0.000000e+00> : vector<1x384xf32>
    %218 = tpu.matmul %210, %0, %cst_48 {dimension_numbers = #tpu.dot_dimension_numbers<[1], [0], [0], [1], [0, 0, 1, 1], [], []>} : vector<1x128xf32>, vector<128x384xf32>, vector<1x384xf32> -> vector<1x384xf32>
    %219 = arith.addf %218, %1 : vector<1x384xf32>
    %220 = vector.extract_strided_slice %217 {offsets = [0, 0], sizes = [1, 128], strides = [1, 1]} : vector<1x384xf32> to vector<1x128xf32>
    %221 = vector.extract_strided_slice %219 {offsets = [0, 0], sizes = [1, 128], strides = [1, 1]} : vector<1x384xf32> to vector<1x128xf32>
    %222 = arith.addf %220, %221 : vector<1x128xf32>
    %223 = arith.negf %222 : vector<1x128xf32>
    %224 = math.exp %223 : vector<1x128xf32>
    %cst_49 = arith.constant 1.000000e+00 : f32
    %225 = vector.broadcast %cst_49 : f32 to vector<1x128xf32>
    %226 = arith.addf %225, %224 : vector<1x128xf32>
    %227 = arith.divf %225, %226 : vector<1x128xf32>
    %228 = vector.extract_strided_slice %217 {offsets = [0, 128], sizes = [1, 128], strides = [1, 1]} : vector<1x384xf32> to vector<1x128xf32>
    %229 = vector.extract_strided_slice %219 {offsets = [0, 128], sizes = [1, 128], strides = [1, 1]} : vector<1x384xf32> to vector<1x128xf32>
    %230 = arith.addf %228, %229 : vector<1x128xf32>
    %231 = arith.negf %230 : vector<1x128xf32>
    %232 = math.exp %231 : vector<1x128xf32>
    %cst_50 = arith.constant 1.000000e+00 : f32
    %233 = vector.broadcast %cst_50 : f32 to vector<1x128xf32>
    %234 = arith.addf %233, %232 : vector<1x128xf32>
    %235 = arith.divf %233, %234 : vector<1x128xf32>
    %236 = vector.extract_strided_slice %217 {offsets = [0, 256], sizes = [1, 128], strides = [1, 1]} : vector<1x384xf32> to vector<1x128xf32>
    %237 = vector.extract_strided_slice %219 {offsets = [0, 256], sizes = [1, 128], strides = [1, 1]} : vector<1x384xf32> to vector<1x128xf32>
    %238 = arith.mulf %227, %237 : vector<1x128xf32>
    %239 = arith.addf %236, %238 : vector<1x128xf32>
    %240 = math.tanh %239 : vector<1x128xf32>
    %cst_51 = arith.constant 1.000000e+00 : f32
    %241 = vector.broadcast %cst_51 : f32 to vector<1x128xf32>
    %242 = arith.subf %241, %235 : vector<1x128xf32>
    %243 = arith.mulf %242, %240 : vector<1x128xf32>
    %244 = arith.mulf %235, %210 : vector<1x128xf32>
    %245 = arith.addf %243, %244 : vector<1x128xf32>
    %246 = arith.index_cast %c6_i32 : i32 to index
    %c0_52 = arith.constant 0 : index
    %247 = vector.load %arg6[%246, %c0_52] : memref<8x128xf32, #tpu.memory_space<vmem>>, vector<1x128xf32>
    tpu.vector_store %arg6[%246, %c0_52], %245 {strides = array<i32>} : memref<8x128xf32, #tpu.memory_space<vmem>>, vector<1x128xf32>,
    %c7_i32 = arith.constant 7 : i32
    %248 = arith.index_cast %c7_i32 : i32 to index
    %249 = memref.load %arg1[%248] : memref<8xi32, #tpu.memory_space<smem>>
    %250 = arith.index_cast %249 : i32 to index
    %c0_53 = arith.constant 0 : index
    %c0_54 = arith.constant 0 : index
    %251 = vector.load %arg2[%250, %c0_53, %c0_54] : memref<2x1x384xf32, #tpu.memory_space<vmem>>, vector<1x1x384xf32>
    %252 = vector.shape_cast %251 : vector<1x1x384xf32> to vector<1x384xf32>
    %cst_55 = arith.constant dense<0.000000e+00> : vector<1x384xf32>
    %253 = tpu.matmul %245, %0, %cst_55 {dimension_numbers = #tpu.dot_dimension_numbers<[1], [0], [0], [1], [0, 0, 1, 1], [], []>} : vector<1x128xf32>, vector<128x384xf32>, vector<1x384xf32> -> vector<1x384xf32>
    %254 = arith.addf %253, %1 : vector<1x384xf32>
    %255 = vector.extract_strided_slice %252 {offsets = [0, 0], sizes = [1, 128], strides = [1, 1]} : vector<1x384xf32> to vector<1x128xf32>
    %256 = vector.extract_strided_slice %254 {offsets = [0, 0], sizes = [1, 128], strides = [1, 1]} : vector<1x384xf32> to vector<1x128xf32>
    %257 = arith.addf %255, %256 : vector<1x128xf32>
    %258 = arith.negf %257 : vector<1x128xf32>
    %259 = math.exp %258 : vector<1x128xf32>
    %cst_56 = arith.constant 1.000000e+00 : f32
    %260 = vector.broadcast %cst_56 : f32 to vector<1x128xf32>
    %261 = arith.addf %260, %259 : vector<1x128xf32>
    %262 = arith.divf %260, %261 : vector<1x128xf32>
    %263 = vector.extract_strided_slice %252 {offsets = [0, 128], sizes = [1, 128], strides = [1, 1]} : vector<1x384xf32> to vector<1x128xf32>
    %264 = vector.extract_strided_slice %254 {offsets = [0, 128], sizes = [1, 128], strides = [1, 1]} : vector<1x384xf32> to vector<1x128xf32>
    %265 = arith.addf %263, %264 : vector<1x128xf32>
    %266 = arith.negf %265 : vector<1x128xf32>
    %267 = math.exp %266 : vector<1x128xf32>
    %cst_57 = arith.constant 1.000000e+00 : f32
    %268 = vector.broadcast %cst_57 : f32 to vector<1x128xf32>
    %269 = arith.addf %268, %267 : vector<1x128xf32>
    %270 = arith.divf %268, %269 : vector<1x128xf32>
    %271 = vector.extract_strided_slice %252 {offsets = [0, 256], sizes = [1, 128], strides = [1, 1]} : vector<1x384xf32> to vector<1x128xf32>
    %272 = vector.extract_strided_slice %254 {offsets = [0, 256], sizes = [1, 128], strides = [1, 1]} : vector<1x384xf32> to vector<1x128xf32>
    %273 = arith.mulf %262, %272 : vector<1x128xf32>
    %274 = arith.addf %271, %273 : vector<1x128xf32>
    %275 = math.tanh %274 : vector<1x128xf32>
    %cst_58 = arith.constant 1.000000e+00 : f32
    %276 = vector.broadcast %cst_58 : f32 to vector<1x128xf32>
    %277 = arith.subf %276, %270 : vector<1x128xf32>
    %278 = arith.mulf %277, %275 : vector<1x128xf32>
    %279 = arith.mulf %270, %245 : vector<1x128xf32>
    %280 = arith.addf %278, %279 : vector<1x128xf32>
    %281 = arith.index_cast %c7_i32 : i32 to index
    %c0_59 = arith.constant 0 : index
    %282 = vector.load %arg6[%281, %c0_59] : memref<8x128xf32, #tpu.memory_space<vmem>>, vector<1x128xf32>
    tpu.vector_store %arg6[%281, %c0_59], %280 {strides = array<i32>} : memref<8x128xf32, #tpu.memory_space<vmem>>, vector<1x128xf32>,
    %c8_i32 = arith.constant 8 : i32
    return
  }
  func.func @transform_0(%arg0: i32, %arg1: memref<8xi32, #tpu.memory_space<smem>>) -> (i32, i32, i32) {
    %c0_i32 = arith.constant 0 : i32
    %c0_i32_0 = arith.constant 0 : i32
    %c0_i32_1 = arith.constant 0 : i32
    %c0_i32_2 = arith.constant 0 : i32
    return %c0_i32, %c0_i32_0, %c0_i32_1 : i32, i32, i32
  }
  func.func @transform_1(%arg0: i32, %arg1: memref<8xi32, #tpu.memory_space<smem>>) -> (i32, i32) {
    %c0_i32 = arith.constant 0 : i32
    %c0_i32_0 = arith.constant 0 : i32
    %c0_i32_1 = arith.constant 0 : i32
    return %c0_i32, %c0_i32_0 : i32, i32
  }
  func.func @transform_2(%arg0: i32, %arg1: memref<8xi32, #tpu.memory_space<smem>>) -> (i32, i32) {
    %c0_i32 = arith.constant 0 : i32
    %c0_i32_0 = arith.constant 0 : i32
    %c0_i32_1 = arith.constant 0 : i32
    return %c0_i32, %c0_i32_0 : i32, i32
  }
  func.func @transform_3(%arg0: i32, %arg1: memref<8xi32, #tpu.memory_space<smem>>) -> (i32, i32) {
    %c0_i32 = arith.constant 0 : i32
    %c0_i32_0 = arith.constant 0 : i32
    %c0_i32_1 = arith.constant 0 : i32
    return %c0_i32, %c0_i32_0 : i32, i32
  }
  func.func @transform_4(%arg0: i32, %arg1: memref<8xi32, #tpu.memory_space<smem>>) -> (i32, i32) {
    %c0_i32 = arith.constant 0 : i32
    %c0_i32_0 = arith.constant 0 : i32
    %c0_i32_1 = arith.constant 0 : i32
    return %c0_i32, %c0_i32_0 : i32, i32
  }
}

</mosaic_0001>

<bundles_post_ra>
// kernel: tpu_custom_call.1
= control target key start
LH: loop header
LB: loop body
LE: loop exit
PB: predicated region body
PF: predicated region fallthrough
CT: control target
= control target key end

     0   :  { %s1375_s21 = smov [#allocation3]   ;;  %s2033_s0 = inlined_call_operand.hbm [shape: s32[8], index: 0, kind: input, shape index: {}]   ;;  %s2034_s1 = inlined_call_operand.hbm [shape: f32[2,1,384], index: 1, kind: input, shape index: {}]   ;;  %s2035_s2 = inlined_call_operand.hbm [shape: f32[1,128], index: 2, kind: input, shape index: {}]   ;;  %s2036_s3 = inlined_call_operand.hbm [shape: f32[128,384], index: 3, kind: input, shape index: {}]   ;;  %s2037_s4 = inlined_call_operand.vmem [shape: f32[1,384], index: 4, kind: input, shape index: {}]   ;;  %s2038_s5 = inlined_call_operand.hbm [shape: f32[8,128], index: 5, kind: output, shape index: {}]  }
   0x1   :  { %s11_s20 = sshll.u32 %s2033_s0, 4  ;;  %s12_s20 = int_to_ptr.hbm [resolvable:$true] %s11_s20 }
   0x2   :  { %14 = dma.hbm_to_smem %s12_s20, 16, %s1375_s21, [#allocation2] }
   0x3   :  { %1367 = dma.done.wait [#allocation2], 16 }
   0x4   :  { %1368 = vsyncadd [#allocation2], 4294967280 }
   0x5   :  { %17 = sfence }
   0x6   :  { %18 = vsyncpa [#allocation5], 0 }
   0x7   :  { %19 = vsyncpa [#allocation8], 0  ;;  %s39_s24 = sshll.u32 %s2035_s2, 4  ;;  %s40_s24 = int_to_ptr.hbm [resolvable:$true] %s39_s24 }
   0x8   :  { %20 = vsyncpa [#allocation6], 0  ;;  %s1376_s25 = smov [#allocation7]   ;;  %s25_s0 = sshll.u32 %s2034_s1, 4  ;;  %s26_s0 = int_to_ptr.hbm [resolvable:$true] %s25_s0 }
   0x9   :  { %s41_s26 = sshll.u32 %s1376_s25, 4  ;;  %s1377_s29 = smov [#allocation4]   ;;  %s42_s26 = int_to_ptr.vmem [resolvable:$true] %s41_s26 }
   0xa   :  { %44 = dma.hbm_to_vmem [thread:$0]  %s40_s24, 16, %s42_s26, [#allocation8]  }
   0xb   :  { %s27_s30 = sshll.u32 %s1377_s29, 4  ;;  %s1378_s6 = smov 48   ;;  %s28_s30 = int_to_ptr.vmem [resolvable:$true] %s27_s30 }
   0xc   :  { %s1379_s7 = smov 3   ;;  %s49_s2 = sshll.u32 %s2036_s3, 4  ;;  %s50_s2 = int_to_ptr.hbm [resolvable:$true] %s49_s2 }
   0xd   :  { %33 = dma.hbm_to_vmem [thread:$0]  %s26_s0, 96, %s28_s30, [#allocation5], %s1378_s6, %s1378_s6, %s1379_s7  }
   0xe   :  { %s1380_s10 = smov [#allocation9]   ;;  %s1381_s12 = smov 384  }
   0xf   :  { %s51_s11 = sshll.u32 %s1380_s10, 4  ;;  %s1382_s13 = smov 24   ;;  %s52_s11 = int_to_ptr.vmem [resolvable:$true] %s51_s11 }
  0x10   :  { %57 = dma.hbm_to_vmem [thread:$0]  %s50_s2, 6144, %s52_s11, [#allocation8], %s1381_s12, %s1381_s12, %s1382_s13  }
  0x11   :  { %1369 = dma.done.wait [#allocation5], 96  }
  0x12   :  { %1370 = vsyncadd [#allocation5], 4294967200 }
  0x13   :  { %1371 = dma.done.wait [#allocation8], 6160  }
  0x14   :  { %1372 = vsyncadd [#allocation8], 4294961136  ;;  %v1426_v0 = vld [vmem:[#allocation9 + $0x168] sm:$0xff]  ;;  %v1428_v1 = vld [vmem:[#allocation9 + $0x170] sm:$0xff]  ;;  %s122_s1 = sld [smem:[#allocation3]]  ;;  %s1383_s10 = smov [#allocation10]  }
  0x15   :  { %v1430_v2 = vld [vmem:[#allocation9 + $0x150] sm:$0xff]  ;;  %133 = vmatpush.msra.mxu0 %v1426_v0  ;;  %153 = vmatpush.msra.mxu1 %v1428_v1  ;;  %v1434_v3 = vld [vmem:[#allocation9 + $0x158] sm:$0xff]  ;;  %v1438_v5 = vld [vmem:[#allocation9 + $0x140] sm:$0xff]  ;;  %s1104_s19 = sld [smem:[#allocation3 + $0x2]]  ;;  %s1070_s11 = sshll.u32 %s1383_s10, 4  ;;  %s1071_s11 = int_to_ptr.vmem [resolvable:$true] %s1070_s11 }
  0x16   :  { %v1436_v4 = vld [vmem:[#allocation9 + $0x138] sm:$0xff]  ;;  %250 = vmatpush.msra.mxu3 %v1426_v0  ;;  %v1443_v6 = vld [vmem:[#allocation9 + $0x120] sm:$0xff]  ;;  %v1445_v7 = vld [vmem:[#allocation9 + $0x128] sm:$0xff]  ;;  %s1107_s22 = sld [smem:[#allocation3 + $0x3]] }
  0x17   :  { %134 = vmatpush.msra.mxu0 %v1430_v2  ;;  %154 = vmatpush.msra.mxu1 %v1434_v3  ;;  %v1450_v8 = vld [vmem:[#allocation9 + $0x108] sm:$0xff]  ;;  %v1452_v9 = vld [vmem:[#allocation9 + $0x110] sm:$0xff]  ;;  %v1459_v11 = vld [vmem:[#allocation9 + $0xf8] sm:$0xff]  ;;  %s1110_s25 = sld [smem:[#allocation3 + $0x4]] }
  0x18   :  { %251 = vmatpush.msra.mxu3 %v1430_v2  ;;  %v1457_v10 = vld [vmem:[#allocation9 + $0xf0] sm:$0xff]  ;;  %v1461_v12 = vld [vmem:[#allocation9 + $0x178] sm:$0xff]  ;;  %v1466_v13 = vld [vmem:[#allocation9 + $0x160] sm:$0xff]  ;;  %s1113_s28 = sld [smem:[#allocation3 + $0x5]] }
  0x19   :  { %135 = vmatpush.msra.mxu0 %v1436_v4  ;;  %155 = vmatpush.msra.mxu1 %v1438_v5  ;;  %v1468_v14 = vld [vmem:[#allocation9 + $0xd8] sm:$0xff]  ;;  %v1470_v15 = vld [vmem:[#allocation9 + $0xe0] sm:$0xff]  ;;  %v1476_v16 = vld [vmem:[#allocation9 + $0x148] sm:$0xff]  ;;  %s1116_s30 = sld [smem:[#allocation3 + $0x6]] }
  0x1a   :  { %252 = vmatpush.msra.mxu3 %v1436_v4  ;;  %173 = vmatpush.msra.mxu2 %v1461_v12  ;;  %v1478_v17 = vld [vmem:[#allocation9 + $0xc0] sm:$0xff]  ;;  %v1480_v18 = vld [vmem:[#allocation9 + $0xc8] sm:$0xff]  ;;  %v1486_v19 = vld [vmem:[#allocation9 + $0x130] sm:$0xff]  ;;  %s123_s3 = smul.u32 3, %s122_s1  ;;  %s1119_s8 = sld [smem:[#allocation3 + $0x7]] }
  0x1b   :  { %136 = vmatpush.msra.mxu0 %v1443_v6  ;;  %156 = vmatpush.msra.mxu1 %v1445_v7  ;;  %v1488_v20 = vld [vmem:[#allocation9 + $0xa8] sm:$0xff]  ;;  %v1490_v21 = vld [vmem:[#allocation9 + $0xb0] sm:$0xff]  ;;  %v1496_v22 = vld [vmem:[#allocation9 + $0x118] sm:$0xff]  ;;  %s364_s20 = smul.u32 3, %s1104_s19  ;;  %s1072_s1 = sshll.u32 %s2038_s5, 4  ;;  %s1073_s1 = int_to_ptr.hbm [resolvable:$true] %s1072_s1 }
  0x1c   :  { %253 = vmatpush.msra.mxu3 %v1443_v6  ;;  %174 = vmatpush.msra.mxu2 %v1466_v13  ;;  %v1498_v23 = vld [vmem:[#allocation9 + $0x90] sm:$0xff]  ;;  %v1500_v24 = vld [vmem:[#allocation9 + $0x98] sm:$0xff]  ;;  %v1506_v25 = vld [vmem:[#allocation9 + $0x100] sm:$0xff]  ;;  %s124_s16 = scalar_lea.vmem [#allocation4], %s123_s3  ;;  %s481_s23 = smul.u32 3, %s1107_s22 }
  0x1d   :  { %137 = vmatpush.msra.mxu0 %v1450_v8  ;;  %157 = vmatpush.msra.mxu1 %v1452_v9  ;;  %v1508_v26 = vld [vmem:[#allocation9 + $0x78] sm:$0xff]  ;;  %v1510_v27 = vld [vmem:[#allocation9 + $0x80] sm:$0xff]  ;;  %v1516_v28 = vld [vmem:[#allocation9 + $0xe8] sm:$0xff]  ;;  %s365_s21 = scalar_lea.vmem [#allocation4], %s364_s20  ;;  %s598_s26 = smul.u32 3, %s1110_s25 }
  0x1e   :  { %254 = vmatpush.msra.mxu3 %v1450_v8  ;;  %175 = vmatpush.msra.mxu2 %v1476_v16  ;;  %v1518_v29 = vld [vmem:[#allocation9 + $0x60] sm:$0xff]  ;;  %v1520_v30 = vld [vmem:[#allocation9 + $0x68] sm:$0xff]  ;;  %v1526_v31 = vld [vmem:[#allocation9 + $0xd0] sm:$0xff]  ;;  %s482_s24 = scalar_lea.vmem [#allocation4], %s481_s23  ;;  %s715_s0 = smul.u32 3, %s1113_s28 }
  0x1f   :  { %138 = vmatpush.msra.mxu0 %v1457_v10  ;;  %158 = vmatpush.msra.mxu1 %v1459_v11  ;;  %v1528_v32 = vld [vmem:[#allocation9 + $0x48] sm:$0xff]  ;;  %v1530_v33 = vld [vmem:[#allocation9 + $0x50] sm:$0xff]  ;;  %v1536_v34 = vld [vmem:[#allocation9 + $0xb8] sm:$0xff]  ;;  %s599_s27 = scalar_lea.vmem [#allocation4], %s598_s26  ;;  %s832_s6 = smul.u32 3, %s1116_s30 }
  0x20   :  { %255 = vmatpush.msra.mxu3 %v1457_v10  ;;  %176 = vmatpush.msra.mxu2 %v1486_v19  ;;  %v1538_v35 = vld [vmem:[#allocation9 + $0x30] sm:$0xff]  ;;  %v1540_v36 = vld [vmem:[#allocation9 + $0x38] sm:$0xff]  ;;  %v1546_v37 = vld [vmem:[#allocation9 + $0xa0] sm:$0xff]  ;;  %s716_s29 = scalar_lea.vmem [#allocation4], %s715_s0  ;;  %s949_s9 = smul.u32 3, %s1119_s8 }
  0x21   :  { %139 = vmatpush.msra.mxu0 %v1468_v14  ;;  %159 = vmatpush.msra.mxu1 %v1470_v15  ;;  %2061 = vst [vmem:[#allocation15_spill] sm:$0xff] %v1538_v35  ;;  %v1548_v38 = vld [vmem:[#allocation9 + $0x18] sm:$0xff]  ;;  %v1550_v39 = vld [vmem:[#allocation9 + $0x20] sm:$0xff]  ;;  %v1556_v40 = vld [vmem:[#allocation9 + $0x88] sm:$0xff]  ;;  %s833_s7 = scalar_lea.vmem [#allocation4], %s832_s6 }
  0x22   :  { %256 = vmatpush.msra.mxu3 %v1468_v14  ;;  %177 = vmatpush.msra.mxu2 %v1496_v22  ;;  %2062 = vst [vmem:[#allocation16_spill] sm:$0xff] %v1540_v36  ;;  %v1558_v41 = vld [vmem:[#allocation9] sm:$0xff]  ;;  %v1560_v42 = vld [vmem:[#allocation9 + $0x8] sm:$0xff]  ;;  %v1566_v43 = vld [vmem:[#allocation7] sm:$0x1]  ;;  %s950_s2 = scalar_lea.vmem [#allocation4], %s949_s9 }
  0x23   :  { %140 = vmatpush.msra.mxu0 %v1478_v17  ;;  %160 = vmatpush.msra.mxu1 %v1480_v18  ;;  %2063 = vst [vmem:[#allocation17_spill] sm:$0xff] %v1548_v38  ;;  %v1569_v44 = vld [vmem:[#allocation9 + $0x70] sm:$0xff]  ;;  %v1576_v45 = vld [vmem:[#allocation9 + $0x58] sm:$0xff]  ;;  %v1580_v46 = vld [vmem:[#allocation9 + $0x40] sm:$0xff] }
  0x24   :  { %257 = vmatpush.msra.mxu3 %v1478_v17  ;;  %178 = vmatpush.msra.mxu2 %v1506_v25  ;;  %2064 = vst [vmem:[#allocation18_spill] sm:$0xff] %v1550_v39  ;;  %v1586_v47 = vld [vmem:[#allocation9 + $0x28] sm:$0xff]  ;;  %v1592_v48 = vld [vmem:[#allocation9 + $0x10] sm:$0xff]  ;;  %v120_v49 = vld [vmem:[%s2037_s4] sm:$0x7]  ;;  %s1101_s4 = sld [smem:[#allocation3 + $0x1]] }
  0x25   :  { %141 = vmatpush.msra.mxu0 %v1488_v20  ;;  %161 = vmatpush.msra.mxu1 %v1490_v21  ;;  %2065 = vst [vmem:[#allocation19_spill] sm:$0xff] %v1558_v41  ;;  %v125_v50 = vld [vmem:[%s124_s16] sm:$0x7]  ;;  %v1706_v51 = vperm.slane %v120_v49, 0  ;;  %v1708_v52 = vperm.slane %v120_v49, 1 }
  0x26   :  { %258 = vmatpush.msra.mxu3 %v1488_v20  ;;  %179 = vmatpush.msra.mxu2 %v1516_v28  ;;  %2066 = vst [vmem:[#allocation20_spill] sm:$0xff] %v1560_v42  ;;  %v214_v53 = vrot.slane %v125_v50, 1 }
  0x27   :  { %142 = vmatpush.msra.mxu0 %v1498_v23  ;;  %162 = vmatpush.msra.mxu1 %v1500_v24  ;;  %2067 = vst [vmem:[#allocation21_spill] sm:$0xff] %v1580_v46 }
  0x28   :  { %259 = vmatpush.msra.mxu3 %v1498_v23  ;;  %180 = vmatpush.msra.mxu2 %v1526_v31  ;;  %2068 = vst [vmem:[#allocation22_spill] sm:$0xff] %v1586_v47 }
  0x29   :  { %143 = vmatpush.msra.mxu0 %v1508_v26  ;;  %163 = vmatpush.msra.mxu1 %v1510_v27  ;;  %2069 = vst [vmem:[#allocation23_spill] sm:$0xff] %v1592_v48 }
  0x2a   :  { %260 = vmatpush.msra.mxu3 %v1508_v26  ;;  %181 = vmatpush.msra.mxu2 %v1536_v34  ;;  %2070 = vst [vmem:[#allocation24_spill] sm:$0xff] %v1706_v51  ;;  %s247_s17 = smul.u32 3, %s1101_s4 }
  0x2b   :  { %144 = vmatpush.msra.mxu0 %v1518_v29  ;;  %164 = vmatpush.msra.mxu1 %v1520_v30  ;;  %2071 = vst [vmem:[#allocation25_spill] sm:$0xff] %v1708_v52 }
  0x2c   :  { %261 = vmatpush.msra.mxu3 %v1518_v29  ;;  %182 = vmatpush.msra.mxu2 %v1546_v37  ;;  %s248_s18 = scalar_lea.vmem [#allocation4], %s247_s17 }
  0x2d   :  { %145 = vmatpush.msra.mxu0 %v1528_v32  ;;  %165 = vmatpush.msra.mxu1 %v1530_v33 }
  0x2e   :  { %262 = vmatpush.msra.mxu3 %v1528_v32  ;;  %183 = vmatpush.msra.mxu2 %v1556_v40 }
  0x2f   :  { %146 = vmatpush.msra.mxu0 %v1538_v35  ;;  %166 = vmatpush.msra.mxu1 %v1540_v36 }
  0x30   :  { %263 = vmatpush.msra.mxu3 %v1538_v35  ;;  %184 = vmatpush.msra.mxu2 %v1569_v44 }
  0x31   :  { %147 = vmatpush.msra.mxu0 %v1548_v38  ;;  %167 = vmatpush.msra.mxu1 %v1550_v39 }
  0x32   :  { %264 = vmatpush.msra.mxu3 %v1548_v38  ;;  %185 = vmatpush.msra.mxu2 %v1576_v45 }
  0x33   :  { %148 = vmatpush.msra.mxu0 %v1558_v41  ;;  %168 = vmatpush.msra.mxu1 %v1560_v42 }
  0x34   :  { %149 = vmatmul.f32.vlgmr.msra.gmra.mxu0 %v1566_v43  ;;  %169 = vmatmul.f32.vlgmr.msra.gmra.mxu1 %v1566_v43 }
  0x35   :  { %270 = vmatpush.msrb.mxu0 %v1428_v1  ;;  %290 = vmatpush.msrb.mxu1 %v1461_v12 }
  0x36   :  { %265 = vmatpush.msra.mxu3 %v1558_v41  ;;  %186 = vmatpush.msra.mxu2 %v1580_v46 }
  0x37   :  { %271 = vmatpush.msrb.mxu0 %v1434_v3  ;;  %291 = vmatpush.msrb.mxu1 %v1466_v13 }
  0x38   :  { %387 = vmatpush.msrb.mxu3 %v1428_v1  ;;  %187 = vmatpush.msra.mxu2 %v1586_v47 }
  0x39   :  { %272 = vmatpush.msrb.mxu0 %v1438_v5  ;;  %292 = vmatpush.msrb.mxu1 %v1476_v16 }
  0x3a   :  { %388 = vmatpush.msrb.mxu3 %v1434_v3  ;;  %188 = vmatpush.msra.mxu2 %v1592_v48 }
  0x3b   :  { %273 = vmatpush.msrb.mxu0 %v1445_v7  ;;  %293 = vmatpush.msrb.mxu1 %v1486_v19 }
  0x3c   :  { %389 = vmatpush.msrb.mxu3 %v1438_v5  ;;  %189 = vmatmul.f32.vlgmr.msra.gmra.mxu2 %v1566_v43 }
  0x3d   :  { %274 = vmatpush.msrb.mxu0 %v1452_v9  ;;  %294 = vmatpush.msrb.mxu1 %v1496_v22 }
  0x3e   :  { %367 = vmatpush.msrb.mxu2 %v1426_v0  ;;  %390 = vmatpush.msrb.mxu3 %v1445_v7 }
  0x3f   :  { %275 = vmatpush.msrb.mxu0 %v1459_v11  ;;  %295 = vmatpush.msrb.mxu1 %v1506_v25 }
  0x40   :  { %368 = vmatpush.msrb.mxu2 %v1430_v2  ;;  %391 = vmatpush.msrb.mxu3 %v1452_v9 }
  0x41   :  { %276 = vmatpush.msrb.mxu0 %v1470_v15  ;;  %296 = vmatpush.msrb.mxu1 %v1516_v28 }
  0x42   :  { %369 = vmatpush.msrb.mxu2 %v1436_v4  ;;  %392 = vmatpush.msrb.mxu3 %v1459_v11 }
  0x43   :  { %277 = vmatpush.msrb.mxu0 %v1480_v18  ;;  %297 = vmatpush.msrb.mxu1 %v1526_v31 }
  0x44   :  { %370 = vmatpush.msrb.mxu2 %v1443_v6  ;;  %393 = vmatpush.msrb.mxu3 %v1470_v15 }
  0x45   :  { %278 = vmatpush.msrb.mxu0 %v1490_v21  ;;  %298 = vmatpush.msrb.mxu1 %v1536_v34 }
  0x46   :  { %371 = vmatpush.msrb.mxu2 %v1450_v8  ;;  %394 = vmatpush.msrb.mxu3 %v1480_v18 }
  0x47   :  { %279 = vmatpush.msrb.mxu0 %v1500_v24  ;;  %299 = vmatpush.msrb.mxu1 %v1546_v37 }
  0x48   :  { %372 = vmatpush.msrb.mxu2 %v1457_v10  ;;  %395 = vmatpush.msrb.mxu3 %v1490_v21 }
  0x49   :  { %280 = vmatpush.msrb.mxu0 %v1510_v27  ;;  %300 = vmatpush.msrb.mxu1 %v1556_v40 }
  0x4a   :  { %373 = vmatpush.msrb.mxu2 %v1468_v14  ;;  %396 = vmatpush.msrb.mxu3 %v1500_v24 }
  0x4b   :  { %281 = vmatpush.msrb.mxu0 %v1520_v30  ;;  %301 = vmatpush.msrb.mxu1 %v1569_v44 }
  0x4c   :  { %374 = vmatpush.msrb.mxu2 %v1478_v17  ;;  %397 = vmatpush.msrb.mxu3 %v1510_v27 }
  0x4d   :  { %282 = vmatpush.msrb.mxu0 %v1530_v33  ;;  %302 = vmatpush.msrb.mxu1 %v1576_v45 }
  0x4e   :  { %375 = vmatpush.msrb.mxu2 %v1488_v20  ;;  %398 = vmatpush.msrb.mxu3 %v1520_v30 }
  0x4f   :  { %283 = vmatpush.msrb.mxu0 %v1540_v36  ;;  %303 = vmatpush.msrb.mxu1 %v1580_v46 }
  0x50   :  { %376 = vmatpush.msrb.mxu2 %v1498_v23  ;;  %399 = vmatpush.msrb.mxu3 %v1530_v33 }
  0x51   :  { %284 = vmatpush.msrb.mxu0 %v1550_v39  ;;  %304 = vmatpush.msrb.mxu1 %v1586_v47 }
  0x52   :  { %377 = vmatpush.msrb.mxu2 %v1508_v26  ;;  %400 = vmatpush.msrb.mxu3 %v1540_v36 }
  0x53   :  { %285 = vmatpush.msrb.mxu0 %v1560_v42  ;;  %305 = vmatpush.msrb.mxu1 %v1592_v48 }
  0x54   :  { %378 = vmatpush.msrb.mxu2 %v1518_v29  ;;  %401 = vmatpush.msrb.mxu3 %v1550_v39 }
  0x55   :  { %407 = vmatpush.msra.mxu0 %v1461_v12  ;;  %484 = vmatpush.msra.mxu1 %v1426_v0 }
  0x56   :  { %379 = vmatpush.msrb.mxu2 %v1528_v32  ;;  %402 = vmatpush.msrb.mxu3 %v1560_v42 }
  0x57   :  { %408 = vmatpush.msra.mxu0 %v1466_v13  ;;  %485 = vmatpush.msra.mxu1 %v1430_v2 }
  0x58   :  { %380 = vmatpush.msrb.mxu2 %v1538_v35 }
  0x59   :  { %409 = vmatpush.msra.mxu0 %v1476_v16  ;;  %486 = vmatpush.msra.mxu1 %v1436_v4 }
  0x5a   :  { %381 = vmatpush.msrb.mxu2 %v1548_v38 }
  0x5b   :  { %410 = vmatpush.msra.mxu0 %v1486_v19  ;;  %487 = vmatpush.msra.mxu1 %v1443_v6 }
  0x5c   :  { %382 = vmatpush.msrb.mxu2 %v1558_v41 }
  0x5d   :  { %411 = vmatpush.msra.mxu0 %v1496_v22  ;;  %488 = vmatpush.msra.mxu1 %v1450_v8 }
  0x5e   :  { %504 = vmatpush.msra.mxu2 %v1428_v1 }
  0x5f   :  { %412 = vmatpush.msra.mxu0 %v1506_v25  ;;  %489 = vmatpush.msra.mxu1 %v1457_v10 }
  0x60   :  { %505 = vmatpush.msra.mxu2 %v1434_v3 }
  0x61   :  { %413 = vmatpush.msra.mxu0 %v1516_v28  ;;  %490 = vmatpush.msra.mxu1 %v1468_v14 }
  0x62   :  { %506 = vmatpush.msra.mxu2 %v1438_v5 }
  0x63   :  { %414 = vmatpush.msra.mxu0 %v1526_v31  ;;  %491 = vmatpush.msra.mxu1 %v1478_v17 }
  0x64   :  { %507 = vmatpush.msra.mxu2 %v1445_v7 }
  0x65   :  { %415 = vmatpush.msra.mxu0 %v1536_v34  ;;  %492 = vmatpush.msra.mxu1 %v1488_v20 }
  0x66   :  { %508 = vmatpush.msra.mxu2 %v1452_v9 }
  0x67   :  { %416 = vmatpush.msra.mxu0 %v1546_v37  ;;  %493 = vmatpush.msra.mxu1 %v1498_v23 }
  0x68   :  { %509 = vmatpush.msra.mxu2 %v1459_v11 }
  0x69   :  { %417 = vmatpush.msra.mxu0 %v1556_v40  ;;  %494 = vmatpush.msra.mxu1 %v1508_v26 }
  0x6a   :  { %510 = vmatpush.msra.mxu2 %v1470_v15 }
  0x6b   :  { %418 = vmatpush.msra.mxu0 %v1569_v44  ;;  %495 = vmatpush.msra.mxu1 %v1518_v29 }
  0x6c   :  { %511 = vmatpush.msra.mxu2 %v1480_v18 }
  0x6d   :  { %419 = vmatpush.msra.mxu0 %v1576_v45  ;;  %496 = vmatpush.msra.mxu1 %v1528_v32 }
  0x6e   :  { %512 = vmatpush.msra.mxu2 %v1490_v21 }
  0x6f   :  { %420 = vmatpush.msra.mxu0 %v1580_v46  ;;  %497 = vmatpush.msra.mxu1 %v1538_v35 }
  0x70   :  { %513 = vmatpush.msra.mxu2 %v1500_v24 }
  0x71   :  { %421 = vmatpush.msra.mxu0 %v1586_v47  ;;  %498 = vmatpush.msra.mxu1 %v1548_v38 }
  0x72   :  { %514 = vmatpush.msra.mxu2 %v1510_v27 }
  0x73   :  { %422 = vmatpush.msra.mxu0 %v1592_v48  ;;  %499 = vmatpush.msra.mxu1 %v1558_v41 }
  0x74   :  { %515 = vmatpush.msra.mxu2 %v1520_v30 }
  0x76   :  { %516 = vmatpush.msra.mxu2 %v1530_v33 }
  0x78   :  { %517 = vmatpush.msra.mxu2 %v1540_v36  ;;  %v1712_v36 = vperm.slane %v120_v49, 2 }
  0x7a   :  { %518 = vmatpush.msra.mxu2 %v1550_v39 }
  0x7c   :  { %519 = vmatpush.msra.mxu2 %v1560_v42 }
  0xb1   :  { %v150_v54 = vpop.f32.mrf.mxu0  ;;  %v170_v55 = vpop.f32.mrf.mxu1 }
  0xb2   :  { %v151_v56 = vadd.f32 %v150_v54, %v1706_v51  ;;  %v171_v57 = vadd.f32 %v170_v55, %v1708_v52  ;;  %v237_v51 = vrot.slane %v125_v50, 2 }
  0xb4   :  { %v193_v58 = vadd.f32 %v151_v56, %v125_v50  ;;  %v216_v59 = vadd.f32 %v214_v53, %v171_v57 }
  0xb6   :  { %v1099_v60 = vmul.f32 -1.442695, %v193_v58  ;;  %v1100_v61 = vmul.f32 -1.442695, %v216_v59 }
  0xb8   :  { %1131 = vpow2.f32 %v1099_v60 }
  0xb9   :  { %1133 = vpow2.f32 %v1100_v61 }
  0xbe   :  { %v1132_v62 = vpop.eup %1131 }
  0xbf   :  { %v1134_v63 = vpop.eup %1133  ;;  %v197_v42 = vadd.f32 1.0, %v1132_v62  ;;  %v190_v56 = vpop.f32.mrf.mxu2 }
  0xc0   :  { %v220_v41 = vadd.f32 1.0, %v1134_v63  ;;  %v191_v60 = vadd.f32 %v190_v56, %v1712_v36 }
  0xc1   :  { %1135 = vrcp.f32 %v197_v42  ;;  %v209_v53 = vand.u32 2147483648, %v197_v42  ;;  %v207_v58 = vand.u32 2147483647, %v197_v42  ;;  %vm203_vm1 = vweird.f32 %v197_v42 }
  0xc2   :  { %1137 = vrcp.f32 %v220_v41  ;;  %vm226_vm4 = vweird.f32 %v220_v41  ;;  %v230_v35 = vand.u32 2147483647, %v220_v41 }
  0xc3   :  { %v210_v62 = vor.u32 1.1754944e-38, %v209_v53  ;;  %vm208_vm3 = vcmp.eq.f32.partialorder %v207_v58, 8.507059e+37  ;;  %v2079_v58 = vld [vmem:[#allocation19_spill] sm:$0xff] }
  0xc4   :  { %vm231_vm7 = vcmp.eq.f32.partialorder %v230_v35, 8.507059e+37  ;;  %v2072_v35 = vld [vmem:[#allocation21_spill] sm:$0xff] }
  0xc7   :  { %v1136_v48 = vpop.eup %1135 }
  0xc8   :  { %v1138_v39 = vpop.eup %1137  ;;  %v199_v38 = vmul.f32 %v1136_v48, %v197_v42  ;;  %vm204_vm0 = vweird.f32 %v1136_v48 }
  0xc9   :  { %v222_v47 = vmul.f32 %v1138_v39, %v220_v41  ;;  %vm205_vm2 = vmor %vm203_vm1, %vm204_vm0  ;;  %vm227_vm5 = vweird.f32 %v1138_v39 }
  0xca   :  { %v200_v54 = vsub.f32 1.0, %v199_v38  ;;  %vm228_vm6 = vmor %vm226_vm4, %vm227_vm5 }
  0xcb   :  { %v223_v55 = vsub.f32 1.0, %v222_v47  ;;  %v232_v47 = vand.u32 2147483648, %v220_v41  ;;  %v2074_v41 = vld [vmem:[#allocation16_spill] sm:$0xff] }
  0xcc   :  { %v201_v57 = vmul.f32 %v1136_v48, %v200_v54 }
  0xcd   :  { %v224_v59 = vmul.f32 %v1138_v39, %v223_v55  ;;  %v233_v55 = vor.u32 1.1754944e-38, %v232_v47 }
  0xce   :  { %v202_v61 = vadd.f32 %v1136_v48, %v201_v57 }
  0xcf   :  { %v225_v38 = vadd.f32 %v1138_v39, %v224_v59  ;;  %v2080_v59 = vld [vmem:[#allocation20_spill] sm:$0xff] }
  0xd0   :  { %v206_v63 = vsel %vm205_vm2, %v1136_v48, %v202_v61 }
  0xd1   :  { %v211_v49 = vsel %vm208_vm3, %v210_v62, %v206_v63  ;;  %v229_v46 = vsel %vm228_vm6, %v1138_v39, %v225_v38  ;;  %v2073_v39 = vld [vmem:[#allocation15_spill] sm:$0xff]  ;;  %v2081_v63 = vld [vmem:[#allocation25_spill] sm:$0xff] }
  0xd2   :  { %v236_v52 = vmul.f32 %v211_v49, %v191_v60  ;;  %v234_v56 = vsel %vm231_vm7, %v233_v55, %v229_v46  ;;  %v2076_v46 = vld [vmem:[#allocation17_spill] sm:$0xff]  ;;  %v2082_v55 = vld [vmem:[#allocation24_spill] sm:$0xff] }
  0xd3   :  { %v241_v42 = vsub.f32 1.0, %v234_v56  ;;  %v243_v48 = vmul.f32 %v234_v56, %v1566_v43  ;;  %v2075_v43 = vld [vmem:[#allocation22_spill] sm:$0xff]  ;;  %v249_v60 = vld [vmem:[%s248_s18] sm:$0x7] }
  0xd4   :  { %v239_v54 = vadd.f32 %v237_v51, %v236_v52  ;;  %v2077_v51 = vld [vmem:[#allocation18_spill] sm:$0xff]  ;;  %v2078_v52 = vld [vmem:[#allocation23_spill] sm:$0xff]  ;;  %v331_v61 = vrot.slane %v249_v60, 1 }
  0xd6   :  { %1139 = vtanh.f32 %v239_v54 }
  0xdc   :  { %v1140_v57 = vpop.eup %1139 }
  0xdd   :  { %v242_v53 = vmul.f32 %v1140_v57, %v241_v42 }
  0xdf   :  { %v1716_v50 = vadd.f32 %v243_v48, %v242_v53 }
  0xe1   :  { %245 = vst [vmem:[#allocation10] sm:$0x1] %v1716_v50  ;;  %266 = vmatmul.f32.vlgmr.msra.gmra.mxu3 %v1716_v50  ;;  %286 = vmatmul.f32.vlgmr.msrb.gmra.mxu0 %v1716_v50 }
  0xe2   :  { %306 = vmatmul.f32.vlgmr.msrb.gmra.mxu1 %v1716_v50  ;;  %524 = vmatpush.msra.mxu3 %v1461_v12 }
  0xe3   :  { %601 = vmatpush.msrb.mxu0 %v1426_v0  ;;  %621 = vmatpush.msrb.mxu1 %v1428_v1 }
  0xe4   :  { %525 = vmatpush.msra.mxu3 %v1466_v13 }
  0xe5   :  { %602 = vmatpush.msrb.mxu0 %v1430_v2  ;;  %622 = vmatpush.msrb.mxu1 %v1434_v3 }
  0xe6   :  { %526 = vmatpush.msra.mxu3 %v1476_v16 }
  0xe7   :  { %603 = vmatpush.msrb.mxu0 %v1436_v4  ;;  %623 = vmatpush.msrb.mxu1 %v1438_v5 }
  0xe8   :  { %527 = vmatpush.msra.mxu3 %v1486_v19 }
  0xe9   :  { %604 = vmatpush.msrb.mxu0 %v1443_v6  ;;  %624 = vmatpush.msrb.mxu1 %v1445_v7 }
  0xea   :  { %528 = vmatpush.msra.mxu3 %v1496_v22 }
  0xeb   :  { %605 = vmatpush.msrb.mxu0 %v1450_v8  ;;  %625 = vmatpush.msrb.mxu1 %v1452_v9 }
  0xec   :  { %529 = vmatpush.msra.mxu3 %v1506_v25 }
  0xed   :  { %606 = vmatpush.msrb.mxu0 %v1457_v10  ;;  %626 = vmatpush.msrb.mxu1 %v1459_v11 }
  0xee   :  { %530 = vmatpush.msra.mxu3 %v1516_v28 }
  0xef   :  { %607 = vmatpush.msrb.mxu0 %v1468_v14  ;;  %627 = vmatpush.msrb.mxu1 %v1470_v15 }
  0xf0   :  { %531 = vmatpush.msra.mxu3 %v1526_v31 }
  0xf1   :  { %608 = vmatpush.msrb.mxu0 %v1478_v17  ;;  %628 = vmatpush.msrb.mxu1 %v1480_v18 }
  0xf2   :  { %532 = vmatpush.msra.mxu3 %v1536_v34 }
  0xf3   :  { %609 = vmatpush.msrb.mxu0 %v1488_v20  ;;  %629 = vmatpush.msrb.mxu1 %v1490_v21 }
  0xf4   :  { %533 = vmatpush.msra.mxu3 %v1546_v37 }
  0xf5   :  { %610 = vmatpush.msrb.mxu0 %v1498_v23  ;;  %630 = vmatpush.msrb.mxu1 %v1500_v24 }
  0xf6   :  { %534 = vmatpush.msra.mxu3 %v1556_v40 }
  0xf7   :  { %611 = vmatpush.msrb.mxu0 %v1508_v26  ;;  %631 = vmatpush.msrb.mxu1 %v1510_v27 }
  0xf8   :  { %535 = vmatpush.msra.mxu3 %v1569_v44 }
  0xf9   :  { %612 = vmatpush.msrb.mxu0 %v1518_v29  ;;  %632 = vmatpush.msrb.mxu1 %v1520_v30 }
  0xfa   :  { %536 = vmatpush.msra.mxu3 %v1576_v45 }
  0xfb   :  { %613 = vmatpush.msrb.mxu0 %v1528_v32  ;;  %633 = vmatpush.msrb.mxu1 %v1530_v33 }
  0xfc   :  { %537 = vmatpush.msra.mxu3 %v2072_v35 }
  0xfd   :  { %614 = vmatpush.msrb.mxu0 %v2073_v39  ;;  %634 = vmatpush.msrb.mxu1 %v2074_v41 }
  0xfe   :  { %538 = vmatpush.msra.mxu3 %v2075_v43 }
  0xff   :  { %615 = vmatpush.msrb.mxu0 %v2076_v46  ;;  %635 = vmatpush.msrb.mxu1 %v2077_v51 }
 0x100   :  { %539 = vmatpush.msra.mxu3 %v2078_v52 }
 0x101   :  { %616 = vmatpush.msrb.mxu0 %v2079_v58  ;;  %636 = vmatpush.msrb.mxu1 %v2080_v59 }
 0x15e   :  { %v287_v62 = vpop.f32.mrf.mxu0 }
 0x15f   :  { %v288_v49 = vadd.f32 %v287_v62, %v2081_v63 }
 0x161   :  { %v333_v38 = vadd.f32 %v331_v61, %v288_v49 }
 0x163   :  { %v1103_v47 = vmul.f32 -1.442695, %v333_v38 }
 0x164   :  { %v267_v54 = vpop.f32.mrf.mxu3 }
 0x165   :  { %1141 = vpow2.f32 %v1103_v47  ;;  %v268_v56 = vadd.f32 %v267_v54, %v2082_v55 }
 0x167   :  { %v310_v42 = vadd.f32 %v268_v56, %v249_v60  ;;  %v307_v56 = vpop.f32.mrf.mxu1 }
 0x169   :  { %v1102_v57 = vmul.f32 -1.442695, %v310_v42 }
 0x16b   :  { %v1142_v53 = vpop.eup %1141  ;;  %1143 = vpow2.f32 %v1102_v57 }
 0x16c   :  { %v337_v48 = vadd.f32 1.0, %v1142_v53  ;;  %v354_v53 = vrot.slane %v249_v60, 2 }
 0x16e   :  { %1145 = vrcp.f32 %v337_v48  ;;  %vm343_vm13 = vweird.f32 %v337_v48 }
 0x171   :  { %v1144_v59 = vpop.eup %1143 }
 0x172   :  { %v314_v58 = vadd.f32 1.0, %v1144_v59  ;;  %v308_v59 = vadd.f32 %v307_v56, %v1712_v36 }
 0x174   :  { %1147 = vrcp.f32 %v314_v58  ;;  %v1146_v52 = vpop.eup %1145  ;;  %v326_v49 = vand.u32 2147483648, %v314_v58  ;;  %v324_v47 = vand.u32 2147483647, %v314_v58  ;;  %vm320_vm9 = vweird.f32 %v314_v58 }
 0x175   :  { %v339_v51 = vmul.f32 %v1146_v52, %v337_v48  ;;  %vm344_vm12 = vweird.f32 %v1146_v52 }
 0x176   :  { %v327_v57 = vor.u32 1.1754944e-38, %v326_v49  ;;  %vm325_vm11 = vcmp.eq.f32.partialorder %v324_v47, 8.507059e+37  ;;  %vm345_vm14 = vmor %vm343_vm13, %vm344_vm12 }
 0x177   :  { %v340_v62 = vsub.f32 1.0, %v339_v51  ;;  %v349_v51 = vand.u32 2147483648, %v337_v48 }
 0x179   :  { %v341_v54 = vmul.f32 %v1146_v52, %v340_v62  ;;  %v350_v35 = vor.u32 1.1754944e-38, %v349_v51 }
 0x17a   :  { %v1148_v46 = vpop.eup %1147 }
 0x17b   :  { %v316_v43 = vmul.f32 %v1148_v46, %v314_v58  ;;  %vm321_vm8 = vweird.f32 %v1148_v46  ;;  %v342_v41 = vadd.f32 %v1146_v52, %v341_v54 }
 0x17c   :  { %vm322_vm10 = vmor %vm320_vm9, %vm321_vm8 }
 0x17d   :  { %v317_v61 = vsub.f32 1.0, %v316_v43  ;;  %v346_v62 = vsel %vm345_vm14, %v1146_v52, %v342_v41  ;;  %v2093_v41 = vld [vmem:[#allocation25_spill] sm:$0xff] }
 0x17f   :  { %v318_v38 = vmul.f32 %v1148_v46, %v317_v61  ;;  %v347_v61 = vand.u32 2147483647, %v337_v48 }
 0x181   :  { %v319_v42 = vadd.f32 %v1148_v46, %v318_v38  ;;  %vm348_vm15 = vcmp.eq.f32.partialorder %v347_v61, 8.507059e+37 }
 0x182   :  { %v351_v58 = vsel %vm348_vm15, %v350_v35, %v346_v62  ;;  %v2092_v35 = vld [vmem:[#allocation24_spill] sm:$0xff] }
 0x183   :  { %v323_v63 = vsel %vm322_vm10, %v1148_v46, %v319_v42  ;;  %v358_v49 = vsub.f32 1.0, %v351_v58  ;;  %v360_v46 = vmul.f32 %v351_v58, %v1716_v50 }
 0x184   :  { %v328_v55 = vsel %vm325_vm11, %v327_v57, %v323_v63 }
 0x185   :  { %v353_v43 = vmul.f32 %v328_v55, %v308_v59 }
 0x187   :  { %v356_v39 = vadd.f32 %v354_v53, %v353_v43 }
 0x189   :  { %1149 = vtanh.f32 %v356_v39 }
 0x18f   :  { %v1150_v60 = vpop.eup %1149 }
 0x190   :  { %v359_v38 = vmul.f32 %v1150_v60, %v358_v49 }
 0x192   :  { %v1774_v47 = vadd.f32 %v360_v46, %v359_v38 }
 0x194   :  { %362 = vst [vmem:[#allocation10 + $0x1] sm:$0x1] %v1774_v47  ;;  %383 = vmatmul.f32.vlgmr.msrb.gmra.mxu2 %v1774_v47  ;;  %403 = vmatmul.f32.vlgmr.msrb.gmra.mxu3 %v1774_v47 }
 0x195   :  { %423 = vmatmul.f32.vlgmr.msra.gmra.mxu0 %v1774_v47  ;;  %641 = vmatpush.msrb.mxu2 %v1461_v12 }
 0x196   :  { %718 = vmatpush.msrb.mxu3 %v1426_v0  ;;  %738 = vmatpush.msra.mxu0 %v1428_v1  ;;  %v2083_v0 = vld [vmem:[#allocation21_spill] sm:$0xff]  ;;  %v2084_v1 = vld [vmem:[#allocation15_spill] sm:$0xff] }
 0x197   :  { %642 = vmatpush.msrb.mxu2 %v1466_v13 }
 0x198   :  { %719 = vmatpush.msrb.mxu3 %v1430_v2  ;;  %739 = vmatpush.msra.mxu0 %v1434_v3  ;;  %v2085_v2 = vld [vmem:[#allocation16_spill] sm:$0xff]  ;;  %v2086_v3 = vld [vmem:[#allocation22_spill] sm:$0xff] }
 0x199   :  { %643 = vmatpush.msrb.mxu2 %v1476_v16 }
 0x19a   :  { %720 = vmatpush.msrb.mxu3 %v1436_v4  ;;  %740 = vmatpush.msra.mxu0 %v1438_v5  ;;  %v2087_v4 = vld [vmem:[#allocation17_spill] sm:$0xff]  ;;  %v2088_v5 = vld [vmem:[#allocation18_spill] sm:$0xff] }
 0x19b   :  { %644 = vmatpush.msrb.mxu2 %v1486_v19 }
 0x19c   :  { %721 = vmatpush.msrb.mxu3 %v1443_v6  ;;  %741 = vmatpush.msra.mxu0 %v1445_v7  ;;  %v2089_v6 = vld [vmem:[#allocation23_spill] sm:$0xff] }
 0x19d   :  { %645 = vmatpush.msrb.mxu2 %v1496_v22  ;;  %v2090_v7 = vld [vmem:[#allocation19_spill] sm:$0xff] }
 0x19e   :  { %722 = vmatpush.msrb.mxu3 %v1450_v8  ;;  %742 = vmatpush.msra.mxu0 %v1452_v9  ;;  %v2091_v8 = vld [vmem:[#allocation20_spill] sm:$0xff]  ;;  %v366_v9 = vld [vmem:[%s365_s21] sm:$0x7] }
 0x19f   :  { %646 = vmatpush.msrb.mxu2 %v1506_v25 }
 0x1a0   :  { %723 = vmatpush.msrb.mxu3 %v1457_v10  ;;  %743 = vmatpush.msra.mxu0 %v1459_v11  ;;  %v448_v10 = vrot.slane %v366_v9, 1 }
 0x1a1   :  { %647 = vmatpush.msrb.mxu2 %v1516_v28 }
 0x1a2   :  { %724 = vmatpush.msrb.mxu3 %v1468_v14  ;;  %744 = vmatpush.msra.mxu0 %v1470_v15 }
 0x1a3   :  { %648 = vmatpush.msrb.mxu2 %v1526_v31 }
 0x1a4   :  { %725 = vmatpush.msrb.mxu3 %v1478_v17  ;;  %745 = vmatpush.msra.mxu0 %v1480_v18 }
 0x1a5   :  { %649 = vmatpush.msrb.mxu2 %v1536_v34 }
 0x1a6   :  { %726 = vmatpush.msrb.mxu3 %v1488_v20  ;;  %746 = vmatpush.msra.mxu0 %v1490_v21 }
 0x1a7   :  { %650 = vmatpush.msrb.mxu2 %v1546_v37 }
 0x1a8   :  { %727 = vmatpush.msrb.mxu3 %v1498_v23  ;;  %747 = vmatpush.msra.mxu0 %v1500_v24 }
 0x1a9   :  { %651 = vmatpush.msrb.mxu2 %v1556_v40 }
 0x1aa   :  { %728 = vmatpush.msrb.mxu3 %v1508_v26  ;;  %748 = vmatpush.msra.mxu0 %v1510_v27 }
 0x1ab   :  { %652 = vmatpush.msrb.mxu2 %v1569_v44 }
 0x1ac   :  { %729 = vmatpush.msrb.mxu3 %v1518_v29  ;;  %749 = vmatpush.msra.mxu0 %v1520_v30 }
 0x1ad   :  { %653 = vmatpush.msrb.mxu2 %v1576_v45 }
 0x1ae   :  { %730 = vmatpush.msrb.mxu3 %v1528_v32  ;;  %750 = vmatpush.msra.mxu0 %v1530_v33 }
 0x1af   :  { %654 = vmatpush.msrb.mxu2 %v2083_v0 }
 0x1b0   :  { %731 = vmatpush.msrb.mxu3 %v2084_v1  ;;  %751 = vmatpush.msra.mxu0 %v2085_v2 }
 0x1b1   :  { %655 = vmatpush.msrb.mxu2 %v2086_v3 }
 0x1b2   :  { %732 = vmatpush.msrb.mxu3 %v2087_v4  ;;  %752 = vmatpush.msra.mxu0 %v2088_v5 }
 0x1b3   :  { %656 = vmatpush.msrb.mxu2 %v2089_v6 }
 0x1b4   :  { %733 = vmatpush.msrb.mxu3 %v2090_v7  ;;  %753 = vmatpush.msra.mxu0 %v2091_v8 }
 0x212   :  { %v424_v46 = vpop.f32.mrf.mxu0 }
 0x217   :  { %v384_v11 = vpop.f32.mrf.mxu2  ;;  %v404_v50 = vpop.f32.mrf.mxu3 }
 0x218   :  { %v385_v39 = vadd.f32 %v384_v11, %v2092_v35  ;;  %v405_v52 = vadd.f32 %v404_v50, %v2093_v41 }
 0x21a   :  { %v427_v63 = vadd.f32 %v385_v39, %v366_v9  ;;  %v450_v55 = vadd.f32 %v448_v10, %v405_v52  ;;  %v425_v39 = vadd.f32 %v424_v46, %v1712_v36  ;;  %v1856_v46 = vld [vmem:[#allocation9 + $0x140] sm:$0xff] }
 0x21c   :  { %v1105_v48 = vmul.f32 -1.442695, %v427_v63  ;;  %v1106_v54 = vmul.f32 -1.442695, %v450_v55  ;;  %v471_v63 = vrot.slane %v366_v9, 2 }
 0x21e   :  { %1151 = vpow2.f32 %v1105_v48 }
 0x21f   :  { %1153 = vpow2.f32 %v1106_v54 }
 0x224   :  { %v1152_v56 = vpop.eup %1151 }
 0x225   :  { %v1154_v42 = vpop.eup %1153  ;;  %v431_v57 = vadd.f32 1.0, %v1152_v56 }
 0x226   :  { %v454_v53 = vadd.f32 1.0, %v1154_v42 }
 0x227   :  { %1155 = vrcp.f32 %v431_v57  ;;  %v443_v58 = vand.u32 2147483648, %v431_v57  ;;  %v441_v38 = vand.u32 2147483647, %v431_v57  ;;  %vm437_vm1 = vweird.f32 %v431_v57 }
 0x228   :  { %1157 = vrcp.f32 %v454_v53  ;;  %v466_v56 = vand.u32 2147483648, %v454_v53  ;;  %vm460_vm5 = vweird.f32 %v454_v53  ;;  %v464_v42 = vand.u32 2147483647, %v454_v53 }
 0x229   :  { %v444_v50 = vor.u32 1.1754944e-38, %v443_v58  ;;  %vm442_vm3 = vcmp.eq.f32.partialorder %v441_v38, 8.507059e+37  ;;  %v1849_v38 = vld [vmem:[#allocation9 + $0x158] sm:$0xff] }
 0x22a   :  { %vm465_vm7 = vcmp.eq.f32.partialorder %v464_v42, 8.507059e+37 }
 0x22d   :  { %v1156_v59 = vpop.eup %1155 }
 0x22e   :  { %v1158_v51 = vpop.eup %1157  ;;  %v433_v43 = vmul.f32 %v1156_v59, %v431_v57  ;;  %vm438_vm0 = vweird.f32 %v1156_v59 }
 0x22f   :  { %v456_v61 = vmul.f32 %v1158_v51, %v454_v53  ;;  %vm439_vm2 = vmor %vm437_vm1, %vm438_vm0  ;;  %vm461_vm4 = vweird.f32 %v1158_v51  ;;  %v1839_v53 = vld [vmem:[#allocation9 + $0x168] sm:$0xff] }
 0x230   :  { %v434_v62 = vsub.f32 1.0, %v433_v43  ;;  %vm462_vm6 = vmor %vm460_vm5, %vm461_vm4 }
 0x231   :  { %v457_v49 = vsub.f32 1.0, %v456_v61 }
 0x232   :  { %v435_v60 = vmul.f32 %v1156_v59, %v434_v62  ;;  %v467_v62 = vor.u32 1.1754944e-38, %v466_v56 }
 0x233   :  { %v458_v10 = vmul.f32 %v1158_v51, %v457_v49 }
 0x234   :  { %v436_v11 = vadd.f32 %v1156_v59, %v435_v60 }
 0x235   :  { %v459_v48 = vadd.f32 %v1158_v51, %v458_v10  ;;  %v1863_v10 = vld [vmem:[#allocation9 + $0x128] sm:$0xff] }
 0x236   :  { %v440_v52 = vsel %vm439_vm2, %v1156_v59, %v436_v11  ;;  %v1870_v11 = vld [vmem:[#allocation9 + $0x110] sm:$0xff] }
 0x237   :  { %v445_v55 = vsel %vm442_vm3, %v444_v50, %v440_v52  ;;  %v463_v61 = vsel %vm462_vm6, %v1158_v51, %v459_v48  ;;  %v1842_v51 = vld [vmem:[#allocation9 + $0x170] sm:$0xff]  ;;  %v1877_v50 = vld [vmem:[#allocation9 + $0xf8] sm:$0xff] }
 0x238   :  { %v470_v54 = vmul.f32 %v445_v55, %v425_v39  ;;  %v468_v57 = vsel %vm465_vm7, %v467_v62, %v463_v61 }
 0x239   :  { %v475_v58 = vsub.f32 1.0, %v468_v57  ;;  %v477_v59 = vmul.f32 %v468_v57, %v1774_v47  ;;  %v1846_v47 = vld [vmem:[#allocation9 + $0x150] sm:$0xff] }
 0x23a   :  { %v473_v43 = vadd.f32 %v471_v63, %v470_v54 }
 0x23c   :  { %1159 = vtanh.f32 %v473_v43 }
 0x242   :  { %v1160_v49 = vpop.eup %1159 }
 0x243   :  { %v476_v60 = vmul.f32 %v1160_v49, %v475_v58  ;;  %v1920_v58 = vld [vmem:[#allocation9 + $0x178] sm:$0xff]  ;;  %v1925_v49 = vld [vmem:[#allocation9 + $0x160] sm:$0xff] }
 0x245   :  { %v1832_v9 = vadd.f32 %v477_v59, %v476_v60  ;;  %v1930_v60 = vld [vmem:[#allocation9 + $0x148] sm:$0xff]  ;;  %v1935_v59 = vld [vmem:[#allocation9 + $0x130] sm:$0xff] }
 0x247   :  { %479 = vst [vmem:[#allocation10 + $0x2] sm:$0x1] %v1832_v9  ;;  %500 = vmatmul.f32.vlgmr.msra.gmra.mxu1 %v1832_v9  ;;  %520 = vmatmul.f32.vlgmr.msra.gmra.mxu2 %v1832_v9 }
 0x248   :  { %540 = vmatmul.f32.vlgmr.msra.gmra.mxu3 %v1832_v9  ;;  %758 = vmatpush.msra.mxu1 %v1461_v12  ;;  %v1853_v12 = vld [vmem:[#allocation9 + $0x138] sm:$0xff] }
 0x249   :  { %835 = vmatpush.msra.mxu2 %v1839_v53  ;;  %855 = vmatpush.msra.mxu3 %v1842_v51 }
 0x24a   :  { %759 = vmatpush.msra.mxu1 %v1466_v13  ;;  %v1860_v13 = vld [vmem:[#allocation9 + $0x120] sm:$0xff] }
 0x24b   :  { %836 = vmatpush.msra.mxu2 %v1846_v47  ;;  %856 = vmatpush.msra.mxu3 %v1849_v38 }
 0x24c   :  { %760 = vmatpush.msra.mxu1 %v1476_v16  ;;  %v1867_v16 = vld [vmem:[#allocation9 + $0x108] sm:$0xff] }
 0x24d   :  { %837 = vmatpush.msra.mxu2 %v1853_v12  ;;  %857 = vmatpush.msra.mxu3 %v1856_v46 }
 0x24e   :  { %761 = vmatpush.msra.mxu1 %v1486_v19  ;;  %v1874_v19 = vld [vmem:[#allocation9 + $0xf0] sm:$0xff] }
 0x24f   :  { %838 = vmatpush.msra.mxu2 %v1860_v13  ;;  %858 = vmatpush.msra.mxu3 %v1863_v10 }
 0x250   :  { %762 = vmatpush.msra.mxu1 %v1496_v22 }
 0x251   :  { %839 = vmatpush.msra.mxu2 %v1867_v16  ;;  %859 = vmatpush.msra.mxu3 %v1870_v11 }
 0x252   :  { %763 = vmatpush.msra.mxu1 %v1506_v25 }
 0x253   :  { %840 = vmatpush.msra.mxu2 %v1874_v19  ;;  %860 = vmatpush.msra.mxu3 %v1877_v50 }
 0x254   :  { %764 = vmatpush.msra.mxu1 %v1516_v28 }
 0x255   :  { %841 = vmatpush.msra.mxu2 %v1468_v14  ;;  %861 = vmatpush.msra.mxu3 %v1470_v15  ;;  %v483_v14 = vld [vmem:[%s482_s24] sm:$0x7] }
 0x256   :  { %765 = vmatpush.msra.mxu1 %v1526_v31 }
 0x257   :  { %842 = vmatpush.msra.mxu2 %v1478_v17  ;;  %862 = vmatpush.msra.mxu3 %v1480_v18 }
 0x258   :  { %766 = vmatpush.msra.mxu1 %v1536_v34 }
 0x259   :  { %843 = vmatpush.msra.mxu2 %v1488_v20  ;;  %863 = vmatpush.msra.mxu3 %v1490_v21  ;;  %v565_v21 = vrot.slane %v483_v14, 1 }
 0x25a   :  { %767 = vmatpush.msra.mxu1 %v1546_v37 }
 0x25b   :  { %844 = vmatpush.msra.mxu2 %v1498_v23  ;;  %864 = vmatpush.msra.mxu3 %v1500_v24 }
 0x25c   :  { %768 = vmatpush.msra.mxu1 %v1556_v40 }
 0x25d   :  { %845 = vmatpush.msra.mxu2 %v1508_v26  ;;  %865 = vmatpush.msra.mxu3 %v1510_v27 }
 0x25e   :  { %769 = vmatpush.msra.mxu1 %v1569_v44 }
 0x25f   :  { %846 = vmatpush.msra.mxu2 %v1518_v29  ;;  %866 = vmatpush.msra.mxu3 %v1520_v30 }
 0x260   :  { %770 = vmatpush.msra.mxu1 %v1576_v45 }
 0x261   :  { %847 = vmatpush.msra.mxu2 %v1528_v32  ;;  %867 = vmatpush.msra.mxu3 %v1530_v33 }
 0x262   :  { %771 = vmatpush.msra.mxu1 %v2083_v0 }
 0x263   :  { %848 = vmatpush.msra.mxu2 %v2084_v1  ;;  %868 = vmatpush.msra.mxu3 %v2085_v2  ;;  %v588_v2 = vrot.slane %v483_v14, 2 }
 0x264   :  { %772 = vmatpush.msra.mxu1 %v2086_v3 }
 0x265   :  { %849 = vmatpush.msra.mxu2 %v2087_v4  ;;  %869 = vmatpush.msra.mxu3 %v2088_v5 }
 0x266   :  { %773 = vmatpush.msra.mxu1 %v2089_v6 }
 0x267   :  { %850 = vmatpush.msra.mxu2 %v2090_v7  ;;  %870 = vmatpush.msra.mxu3 %v2091_v8 }
 0x2c4   :  { %v501_v15 = vpop.f32.mrf.mxu1 }
 0x2c5   :  { %v502_v17 = vadd.f32 %v501_v15, %v2092_v35  ;;  %v1962_v15 = vld [vmem:[#allocation9 + $0x88] sm:$0xff] }
 0x2c7   :  { %v544_v18 = vadd.f32 %v502_v17, %v483_v14  ;;  %v1240_v14 = vld [vmem:[#allocation9 + $0x98] sm:$0xff] }
 0x2c8   :  { %v1242_v17 = vld [vmem:[#allocation9 + $0x78] sm:$0xff] }
 0x2c9   :  { %v1108_v20 = vmul.f32 -1.442695, %v544_v18  ;;  %v1243_v18 = vld [vmem:[#allocation9 + $0x80] sm:$0xff] }
 0x2ca   :  { %v521_v22 = vpop.f32.mrf.mxu2 }
 0x2cb   :  { %1161 = vpow2.f32 %v1108_v20  ;;  %v522_v23 = vadd.f32 %v521_v22, %v2093_v41  ;;  %v541_v44 = vpop.f32.mrf.mxu3  ;;  %v1965_v20 = vld [vmem:[#allocation9 + $0x70] sm:$0xff]  ;;  %v1246_v22 = vld [vmem:[#allocation9 + $0x68] sm:$0xff] }
 0x2cc   :  { %v542_v4 = vadd.f32 %v541_v44, %v1712_v36 }
 0x2cd   :  { %v567_v24 = vadd.f32 %v565_v21, %v522_v23  ;;  %v1245_v21 = vld [vmem:[#allocation9 + $0x60] sm:$0xff]  ;;  %v1968_v23 = vld [vmem:[#allocation9 + $0x58] sm:$0xff] }
 0x2cf   :  { %v1109_v25 = vmul.f32 -1.442695, %v567_v24  ;;  %v1248_v24 = vld [vmem:[#allocation9 + $0x48] sm:$0xff] }
 0x2d1   :  { %v1162_v26 = vpop.eup %1161  ;;  %1163 = vpow2.f32 %v1109_v25  ;;  %v1249_v25 = vld [vmem:[#allocation9 + $0x50] sm:$0xff] }
 0x2d2   :  { %v548_v27 = vadd.f32 1.0, %v1162_v26  ;;  %v1971_v26 = vld [vmem:[#allocation9 + $0x40] sm:$0xff] }
 0x2d4   :  { %1165 = vrcp.f32 %v548_v27  ;;  %v560_v33 = vand.u32 2147483648, %v548_v27  ;;  %v558_v37 = vand.u32 2147483647, %v548_v27  ;;  %vm554_vm9 = vweird.f32 %v548_v27 }
 0x2d6   :  { %v561_v1 = vor.u32 1.1754944e-38, %v560_v33  ;;  %vm559_vm11 = vcmp.eq.f32.partialorder %v558_v37, 8.507059e+37  ;;  %v1257_v33 = vld [vmem:[#allocation9] sm:$0xff]  ;;  %v600_v37 = vld [vmem:[%s599_s27] sm:$0x7] }
 0x2d7   :  { %v1164_v28 = vpop.eup %1163 }
 0x2d8   :  { %v571_v29 = vadd.f32 1.0, %v1164_v28  ;;  %v1252_v28 = vld [vmem:[#allocation9 + $0x38] sm:$0xff] }
 0x2da   :  { %v1166_v30 = vpop.eup %1165  ;;  %1167 = vrcp.f32 %v571_v29  ;;  %v583_v8 = vand.u32 2147483648, %v571_v29  ;;  %v581_v52 = vand.u32 2147483647, %v571_v29  ;;  %vm577_vm13 = vweird.f32 %v571_v29 }
 0x2db   :  { %v550_v31 = vmul.f32 %v1166_v30, %v548_v27  ;;  %vm555_vm8 = vweird.f32 %v1166_v30  ;;  %v1251_v27 = vld [vmem:[#allocation9 + $0x30] sm:$0xff] }
 0x2dc   :  { %vm556_vm10 = vmor %vm554_vm9, %vm555_vm8  ;;  %v584_v48 = vor.u32 1.1754944e-38, %v583_v8  ;;  %vm582_vm15 = vcmp.eq.f32.partialorder %v581_v52, 8.507059e+37 }
 0x2dd   :  { %v551_v32 = vsub.f32 1.0, %v550_v31  ;;  %v1255_v31 = vld [vmem:[#allocation9 + $0x20] sm:$0xff] }
 0x2df   :  { %v552_v34 = vmul.f32 %v1166_v30, %v551_v32  ;;  %v1977_v32 = vld [vmem:[#allocation9 + $0x10] sm:$0xff] }
 0x2e0   :  { %v1168_v40 = vpop.eup %1167 }
 0x2e1   :  { %v573_v45 = vmul.f32 %v1168_v40, %v571_v29  ;;  %v553_v0 = vadd.f32 %v1166_v30, %v552_v34  ;;  %vm578_vm12 = vweird.f32 %v1168_v40  ;;  %v1974_v29 = vld [vmem:[#allocation9 + $0x28] sm:$0xff] }
 0x2e2   :  { %vm579_vm14 = vmor %vm577_vm13, %vm578_vm12  ;;  %v1258_v34 = vld [vmem:[#allocation9 + $0x8] sm:$0xff] }
 0x2e3   :  { %v574_v3 = vsub.f32 1.0, %v573_v45  ;;  %v557_v5 = vsel %vm556_vm10, %v1166_v30, %v553_v0  ;;  %v1254_v30 = vld [vmem:[#allocation9 + $0x18] sm:$0xff] }
 0x2e4   :  { %v562_v6 = vsel %vm559_vm11, %v561_v1, %v557_v5 }
 0x2e5   :  { %v575_v7 = vmul.f32 %v1168_v40, %v574_v3  ;;  %v587_v39 = vmul.f32 %v562_v6, %v542_v4 }
 0x2e7   :  { %v576_v63 = vadd.f32 %v1168_v40, %v575_v7  ;;  %v590_v55 = vadd.f32 %v588_v2, %v587_v39 }
 0x2e9   :  { %v580_v54 = vsel %vm579_vm14, %v1168_v40, %v576_v63  ;;  %1169 = vtanh.f32 %v590_v55  ;;  %v682_v40 = vrot.slane %v600_v37, 1 }
 0x2ea   :  { %v585_v56 = vsel %vm582_vm15, %v584_v48, %v580_v54 }
 0x2eb   :  { %v592_v42 = vsub.f32 1.0, %v585_v56  ;;  %v594_v62 = vmul.f32 %v585_v56, %v1832_v9  ;;  %v1940_v9 = vld [vmem:[#allocation9 + $0x118] sm:$0xff] }
 0x2ef   :  { %v1170_v43 = vpop.eup %1169 }
 0x2f0   :  { %v593_v61 = vmul.f32 %v1170_v43, %v592_v42 }
 0x2f2   :  { %v1914_v57 = vadd.f32 %v594_v62, %v593_v61 }
 0x2f4   :  { %596 = vst [vmem:[#allocation10 + $0x3] sm:$0x1] %v1914_v57  ;;  %617 = vmatmul.f32.vlgmr.msrb.gmra.mxu0 %v1914_v57  ;;  %637 = vmatmul.f32.vlgmr.msrb.gmra.mxu1 %v1914_v57 }
 0x2f5   :  { %657 = vmatmul.f32.vlgmr.msrb.gmra.mxu2 %v1914_v57  ;;  %875 = vmatpush.msrb.mxu0 %v1920_v58 }
 0x2f6   :  { %952 = vmatpush.msrb.mxu1 %v1839_v53  ;;  %972 = vmatpush.msrb.mxu2 %v1842_v51  ;;  %v1945_v53 = vld [vmem:[#allocation9 + $0x100] sm:$0xff]  ;;  %v1950_v51 = vld [vmem:[#allocation9 + $0xe8] sm:$0xff] }
 0x2f7   :  { %876 = vmatpush.msrb.mxu0 %v1925_v49 }
 0x2f8   :  { %953 = vmatpush.msrb.mxu1 %v1846_v47  ;;  %973 = vmatpush.msrb.mxu2 %v1849_v38  ;;  %v1230_v47 = vld [vmem:[#allocation9 + $0xd8] sm:$0xff]  ;;  %v1231_v38 = vld [vmem:[#allocation9 + $0xe0] sm:$0xff] }
 0x2f9   :  { %877 = vmatpush.msrb.mxu0 %v1930_v60 }
 0x2fa   :  { %954 = vmatpush.msrb.mxu1 %v1853_v12  ;;  %974 = vmatpush.msrb.mxu2 %v1856_v46  ;;  %v1953_v12 = vld [vmem:[#allocation9 + $0xd0] sm:$0xff]  ;;  %v1233_v46 = vld [vmem:[#allocation9 + $0xc0] sm:$0xff] }
 0x2fb   :  { %878 = vmatpush.msrb.mxu0 %v1935_v59 }
 0x2fc   :  { %955 = vmatpush.msrb.mxu1 %v1860_v13  ;;  %975 = vmatpush.msrb.mxu2 %v1863_v10  ;;  %v1234_v13 = vld [vmem:[#allocation9 + $0xc8] sm:$0xff]  ;;  %v1956_v10 = vld [vmem:[#allocation9 + $0xb8] sm:$0xff] }
 0x2fd   :  { %879 = vmatpush.msrb.mxu0 %v1940_v9 }
 0x2fe   :  { %956 = vmatpush.msrb.mxu1 %v1867_v16  ;;  %976 = vmatpush.msrb.mxu2 %v1870_v11  ;;  %v1236_v16 = vld [vmem:[#allocation9 + $0xa8] sm:$0xff]  ;;  %v1237_v11 = vld [vmem:[#allocation9 + $0xb0] sm:$0xff] }
 0x2ff   :  { %880 = vmatpush.msrb.mxu0 %v1945_v53 }
 0x300   :  { %957 = vmatpush.msrb.mxu1 %v1874_v19  ;;  %977 = vmatpush.msrb.mxu2 %v1877_v50  ;;  %v1959_v19 = vld [vmem:[#allocation9 + $0xa0] sm:$0xff]  ;;  %v1239_v50 = vld [vmem:[#allocation9 + $0x90] sm:$0xff] }
 0x301   :  { %881 = vmatpush.msrb.mxu0 %v1950_v51 }
 0x302   :  { %958 = vmatpush.msrb.mxu1 %v1230_v47  ;;  %978 = vmatpush.msrb.mxu2 %v1231_v38 }
 0x303   :  { %882 = vmatpush.msrb.mxu0 %v1953_v12 }
 0x304   :  { %959 = vmatpush.msrb.mxu1 %v1233_v46  ;;  %979 = vmatpush.msrb.mxu2 %v1234_v13 }
 0x305   :  { %883 = vmatpush.msrb.mxu0 %v1956_v10 }
 0x306   :  { %960 = vmatpush.msrb.mxu1 %v1236_v16  ;;  %980 = vmatpush.msrb.mxu2 %v1237_v11  ;;  %v705_v11 = vrot.slane %v600_v37, 2 }
 0x307   :  { %884 = vmatpush.msrb.mxu0 %v1959_v19 }
 0x308   :  { %961 = vmatpush.msrb.mxu1 %v1239_v50  ;;  %981 = vmatpush.msrb.mxu2 %v1240_v14 }
 0x309   :  { %885 = vmatpush.msrb.mxu0 %v1962_v15 }
 0x30a   :  { %962 = vmatpush.msrb.mxu1 %v1242_v17  ;;  %982 = vmatpush.msrb.mxu2 %v1243_v18 }
 0x30b   :  { %886 = vmatpush.msrb.mxu0 %v1965_v20 }
 0x30c   :  { %963 = vmatpush.msrb.mxu1 %v1245_v21  ;;  %983 = vmatpush.msrb.mxu2 %v1246_v22 }
 0x30d   :  { %887 = vmatpush.msrb.mxu0 %v1968_v23 }
 0x30e   :  { %964 = vmatpush.msrb.mxu1 %v1248_v24  ;;  %984 = vmatpush.msrb.mxu2 %v1249_v25 }
 0x30f   :  { %888 = vmatpush.msrb.mxu0 %v1971_v26 }
 0x310   :  { %965 = vmatpush.msrb.mxu1 %v1251_v27  ;;  %985 = vmatpush.msrb.mxu2 %v1252_v28 }
 0x311   :  { %889 = vmatpush.msrb.mxu0 %v1974_v29 }
 0x312   :  { %966 = vmatpush.msrb.mxu1 %v1254_v30  ;;  %986 = vmatpush.msrb.mxu2 %v1255_v31 }
 0x313   :  { %890 = vmatpush.msrb.mxu0 %v1977_v32 }
 0x314   :  { %967 = vmatpush.msrb.mxu1 %v1257_v33  ;;  %987 = vmatpush.msrb.mxu2 %v1258_v34 }
 0x371   :  { %v618_v44 = vpop.f32.mrf.mxu0  ;;  %v638_v45 = vpop.f32.mrf.mxu1 }
 0x372   :  { %v619_v0 = vadd.f32 %v618_v44, %v2092_v35  ;;  %v639_v1 = vadd.f32 %v638_v45, %v2093_v41 }
 0x374   :  { %v661_v2 = vadd.f32 %v619_v0, %v600_v37  ;;  %v684_v3 = vadd.f32 %v682_v40, %v639_v1 }
 0x376   :  { %v1111_v4 = vmul.f32 -1.442695, %v661_v2  ;;  %v1112_v5 = vmul.f32 -1.442695, %v684_v3 }
 0x378   :  { %1171 = vpow2.f32 %v1111_v4  ;;  %v658_v47 = vpop.f32.mrf.mxu2 }
 0x379   :  { %1173 = vpow2.f32 %v1112_v5  ;;  %v659_v13 = vadd.f32 %v658_v47, %v1712_v36 }
 0x37e   :  { %v1172_v6 = vpop.eup %1171 }
 0x37f   :  { %v1174_v7 = vpop.eup %1173  ;;  %v665_v8 = vadd.f32 1.0, %v1172_v6 }
 0x380   :  { %v688_v39 = vadd.f32 1.0, %v1174_v7 }
 0x381   :  { %1175 = vrcp.f32 %v665_v8  ;;  %v677_v42 = vand.u32 2147483648, %v665_v8  ;;  %v675_v61 = vand.u32 2147483647, %v665_v8  ;;  %vm671_vm1 = vweird.f32 %v665_v8 }
 0x382   :  { %1177 = vrcp.f32 %v688_v39  ;;  %v700_v17 = vand.u32 2147483648, %v688_v39  ;;  %vm694_vm5 = vweird.f32 %v688_v39  ;;  %v698_v21 = vand.u32 2147483647, %v688_v39 }
 0x383   :  { %v678_v46 = vor.u32 1.1754944e-38, %v677_v42  ;;  %vm676_vm3 = vcmp.eq.f32.partialorder %v675_v61, 8.507059e+37 }
 0x384   :  { %v701_v25 = vor.u32 1.1754944e-38, %v700_v17  ;;  %vm699_vm7 = vcmp.eq.f32.partialorder %v698_v21, 8.507059e+37 }
 0x387   :  { %v1176_v52 = vpop.eup %1175 }
 0x388   :  { %v1178_v63 = vpop.eup %1177  ;;  %v667_v55 = vmul.f32 %v1176_v52, %v665_v8  ;;  %vm672_vm0 = vweird.f32 %v1176_v52 }
 0x389   :  { %v690_v48 = vmul.f32 %v1178_v63, %v688_v39  ;;  %vm673_vm2 = vmor %vm671_vm1, %vm672_vm0  ;;  %vm695_vm4 = vweird.f32 %v1178_v63 }
 0x38a   :  { %v668_v54 = vsub.f32 1.0, %v667_v55  ;;  %vm696_vm6 = vmor %vm694_vm5, %vm695_vm4 }
 0x38b   :  { %v691_v56 = vsub.f32 1.0, %v690_v48 }
 0x38c   :  { %v669_v43 = vmul.f32 %v1176_v52, %v668_v54 }
 0x38d   :  { %v692_v62 = vmul.f32 %v1178_v63, %v691_v56 }
 0x38e   :  { %v670_v38 = vadd.f32 %v1176_v52, %v669_v43 }
 0x38f   :  { %v693_v14 = vadd.f32 %v1178_v63, %v692_v62 }
 0x390   :  { %v674_v16 = vsel %vm673_vm2, %v1176_v52, %v670_v38 }
 0x391   :  { %v679_v50 = vsel %vm676_vm3, %v678_v46, %v674_v16  ;;  %v697_v24 = vsel %vm696_vm6, %v1178_v63, %v693_v14 }
 0x392   :  { %v704_v18 = vmul.f32 %v679_v50, %v659_v13  ;;  %v702_v27 = vsel %vm699_vm7, %v701_v25, %v697_v24  ;;  %v834_v13 = vld [vmem:[%s833_s7] sm:$0x7] }
 0x393   :  { %v709_v28 = vsub.f32 1.0, %v702_v27  ;;  %v711_v33 = vmul.f32 %v702_v27, %v1914_v57  ;;  %v717_v57 = vld [vmem:[%s716_s29] sm:$0x7]  ;;  %v916_v16 = vrot.slane %v834_v13, 1 }
 0x394   :  { %v707_v22 = vadd.f32 %v705_v11, %v704_v18  ;;  %v822_v6 = vrot.slane %v717_v57, 2 }
 0x396   :  { %1179 = vtanh.f32 %v707_v22 }
 0x39c   :  { %v1180_v30 = vpop.eup %1179 }
 0x39d   :  { %v710_v31 = vmul.f32 %v1180_v30, %v709_v28 }
 0x39f   :  { %v1984_v34 = vadd.f32 %v711_v33, %v710_v31 }
 0x3a1   :  { %713 = vst [vmem:[#allocation10 + $0x4] sm:$0x1] %v1984_v34  ;;  %734 = vmatmul.f32.vlgmr.msrb.gmra.mxu3 %v1984_v34  ;;  %754 = vmatmul.f32.vlgmr.msra.gmra.mxu0 %v1984_v34 }
 0x3a2   :  { %774 = vmatmul.f32.vlgmr.msra.gmra.mxu1 %v1984_v34  ;;  %992 = vmatpush.msrb.mxu3 %v1920_v58  ;;  %v799_v58 = vrot.slane %v717_v57, 1 }
 0x3a4   :  { %993 = vmatpush.msrb.mxu3 %v1925_v49 }
 0x3a6   :  { %994 = vmatpush.msrb.mxu3 %v1930_v60 }
 0x3a8   :  { %995 = vmatpush.msrb.mxu3 %v1935_v59 }
 0x3aa   :  { %996 = vmatpush.msrb.mxu3 %v1940_v9 }
 0x3ac   :  { %997 = vmatpush.msrb.mxu3 %v1945_v53 }
 0x3ae   :  { %998 = vmatpush.msrb.mxu3 %v1950_v51 }
 0x3b0   :  { %999 = vmatpush.msrb.mxu3 %v1953_v12 }
 0x3b2   :  { %1000 = vmatpush.msrb.mxu3 %v1956_v10 }
 0x3b4   :  { %1001 = vmatpush.msrb.mxu3 %v1959_v19 }
 0x3b6   :  { %1002 = vmatpush.msrb.mxu3 %v1962_v15 }
 0x3b8   :  { %1003 = vmatpush.msrb.mxu3 %v1965_v20 }
 0x3ba   :  { %1004 = vmatpush.msrb.mxu3 %v1968_v23 }
 0x3bc   :  { %1005 = vmatpush.msrb.mxu3 %v1971_v26 }
 0x3be   :  { %1006 = vmatpush.msrb.mxu3 %v1974_v29 }
 0x3c0   :  { %1007 = vmatpush.msrb.mxu3 %v1977_v32 }
 0x41e   :  { %v755_v49 = vpop.f32.mrf.mxu0 }
 0x41f   :  { %v756_v60 = vadd.f32 %v755_v49, %v2093_v41  ;;  %v775_v3 = vpop.f32.mrf.mxu1 }
 0x420   :  { %v776_v7 = vadd.f32 %v775_v3, %v1712_v36 }
 0x421   :  { %v801_v59 = vadd.f32 %v799_v58, %v756_v60 }
 0x423   :  { %v1115_v9 = vmul.f32 -1.442695, %v801_v59 }
 0x424   :  { %v735_v53 = vpop.f32.mrf.mxu3 }
 0x425   :  { %1181 = vpow2.f32 %v1115_v9  ;;  %v736_v51 = vadd.f32 %v735_v53, %v2092_v35 }
 0x427   :  { %v778_v12 = vadd.f32 %v736_v51, %v717_v57 }
 0x429   :  { %v1114_v10 = vmul.f32 -1.442695, %v778_v12 }
 0x42b   :  { %v1182_v19 = vpop.eup %1181  ;;  %1183 = vpow2.f32 %v1114_v10 }
 0x42c   :  { %v805_v15 = vadd.f32 1.0, %v1182_v19 }
 0x42e   :  { %1185 = vrcp.f32 %v805_v15  ;;  %v817_v63 = vand.u32 2147483648, %v805_v15  ;;  %vm811_vm13 = vweird.f32 %v805_v15  ;;  %v815_v48 = vand.u32 2147483647, %v805_v15 }
 0x430   :  { %v818_v42 = vor.u32 1.1754944e-38, %v817_v63  ;;  %vm816_vm15 = vcmp.eq.f32.partialorder %v815_v48, 8.507059e+37 }
 0x431   :  { %v1184_v20 = vpop.eup %1183 }
 0x432   :  { %v782_v23 = vadd.f32 1.0, %v1184_v20  ;;  %v939_v20 = vrot.slane %v834_v13, 2 }
 0x434   :  { %1187 = vrcp.f32 %v782_v23  ;;  %v1186_v26 = vpop.eup %1185  ;;  %v794_v45 = vand.u32 2147483648, %v782_v23  ;;  %v792_v1 = vand.u32 2147483647, %v782_v23  ;;  %vm788_vm9 = vweird.f32 %v782_v23 }
 0x435   :  { %v807_v29 = vmul.f32 %v1186_v26, %v805_v15  ;;  %vm812_vm12 = vweird.f32 %v1186_v26 }
 0x436   :  { %v795_v5 = vor.u32 1.1754944e-38, %v794_v45  ;;  %vm793_vm11 = vcmp.eq.f32.partialorder %v792_v1, 8.507059e+37  ;;  %vm813_vm14 = vmor %vm811_vm13, %vm812_vm12 }
 0x437   :  { %v808_v40 = vsub.f32 1.0, %v807_v29 }
 0x439   :  { %v809_v2 = vmul.f32 %v1186_v26, %v808_v40 }
 0x43a   :  { %v1188_v32 = vpop.eup %1187 }
 0x43b   :  { %v784_v37 = vmul.f32 %v1188_v32, %v782_v23  ;;  %vm789_vm8 = vweird.f32 %v1188_v32  ;;  %v810_v52 = vadd.f32 %v1186_v26, %v809_v2 }
 0x43c   :  { %vm790_vm10 = vmor %vm788_vm9, %vm789_vm8 }
 0x43d   :  { %v785_v44 = vsub.f32 1.0, %v784_v37  ;;  %v814_v56 = vsel %vm813_vm14, %v1186_v26, %v810_v52 }
 0x43e   :  { %v819_v43 = vsel %vm816_vm15, %v818_v42, %v814_v56 }
 0x43f   :  { %v786_v0 = vmul.f32 %v1188_v32, %v785_v44  ;;  %v826_v61 = vsub.f32 1.0, %v819_v43  ;;  %v828_v38 = vmul.f32 %v819_v43, %v1984_v34 }
 0x441   :  { %v787_v4 = vadd.f32 %v1188_v32, %v786_v0 }
 0x443   :  { %v791_v8 = vsel %vm790_vm10, %v1188_v32, %v787_v4 }
 0x444   :  { %v796_v39 = vsel %vm793_vm11, %v795_v5, %v791_v8 }
 0x445   :  { %v821_v55 = vmul.f32 %v796_v39, %v776_v7 }
 0x447   :  { %v824_v54 = vadd.f32 %v822_v6, %v821_v55  ;;  %v951_v6 = vld [vmem:[%s950_s2] sm:$0x7] }
 0x448   :  { %v1033_v63 = vrot.slane %v951_v6, 1 }
 0x449   :  { %1189 = vtanh.f32 %v824_v54 }
 0x44f   :  { %v1190_v62 = vpop.eup %1189 }
 0x450   :  { %v827_v47 = vmul.f32 %v1190_v62, %v826_v61 }
 0x452   :  { %v2010_v46 = vadd.f32 %v828_v38, %v827_v47 }
 0x454   :  { %830 = vst [vmem:[#allocation10 + $0x5] sm:$0x1] %v2010_v46  ;;  %851 = vmatmul.f32.vlgmr.msra.gmra.mxu2 %v2010_v46  ;;  %871 = vmatmul.f32.vlgmr.msra.gmra.mxu3 %v2010_v46 }
 0x455   :  { %891 = vmatmul.f32.vlgmr.msrb.gmra.mxu0 %v2010_v46 }
 0x4d2   :  { %v892_v53 = vpop.f32.mrf.mxu0 }
 0x4d3   :  { %v893_v19 = vadd.f32 %v892_v53, %v1712_v36 }
 0x4d7   :  { %v852_v11 = vpop.f32.mrf.mxu2  ;;  %v872_v50 = vpop.f32.mrf.mxu3 }
 0x4d8   :  { %v853_v14 = vadd.f32 %v852_v11, %v2092_v35  ;;  %v873_v17 = vadd.f32 %v872_v50, %v2093_v41 }
 0x4da   :  { %v895_v18 = vadd.f32 %v853_v14, %v834_v13  ;;  %v918_v21 = vadd.f32 %v916_v16, %v873_v17 }
 0x4dc   :  { %v1117_v22 = vmul.f32 -1.442695, %v895_v18  ;;  %v1118_v24 = vmul.f32 -1.442695, %v918_v21  ;;  %v1056_v18 = vrot.slane %v951_v6, 2 }
 0x4de   :  { %1191 = vpow2.f32 %v1117_v22 }
 0x4df   :  { %1193 = vpow2.f32 %v1118_v24 }
 0x4e4   :  { %v1192_v25 = vpop.eup %1191 }
 0x4e5   :  { %v1194_v27 = vpop.eup %1193  ;;  %v899_v28 = vadd.f32 1.0, %v1192_v25 }
 0x4e6   :  { %v922_v30 = vadd.f32 1.0, %v1194_v27 }
 0x4e7   :  { %1195 = vrcp.f32 %v899_v28  ;;  %v911_v49 = vand.u32 2147483648, %v899_v28  ;;  %v909_v9 = vand.u32 2147483647, %v899_v28  ;;  %vm905_vm1 = vweird.f32 %v899_v28 }
 0x4e8   :  { %1197 = vrcp.f32 %v922_v30  ;;  %v934_v32 = vand.u32 2147483648, %v922_v30  ;;  %vm928_vm5 = vweird.f32 %v922_v30  ;;  %v932_v37 = vand.u32 2147483647, %v922_v30 }
 0x4e9   :  { %v912_v10 = vor.u32 1.1754944e-38, %v911_v49  ;;  %vm910_vm3 = vcmp.eq.f32.partialorder %v909_v9, 8.507059e+37 }
 0x4ea   :  { %v935_v45 = vor.u32 1.1754944e-38, %v934_v32  ;;  %vm933_vm7 = vcmp.eq.f32.partialorder %v932_v37, 8.507059e+37 }
 0x4ed   :  { %v1196_v31 = vpop.eup %1195 }
 0x4ee   :  { %v1198_v33 = vpop.eup %1197  ;;  %v901_v34 = vmul.f32 %v1196_v31, %v899_v28  ;;  %vm906_vm0 = vweird.f32 %v1196_v31 }
 0x4ef   :  { %v924_v57 = vmul.f32 %v1198_v33, %v922_v30  ;;  %vm907_vm2 = vmor %vm905_vm1, %vm906_vm0  ;;  %vm929_vm4 = vweird.f32 %v1198_v33 }
 0x4f0   :  { %v902_v58 = vsub.f32 1.0, %v901_v34  ;;  %vm930_vm6 = vmor %vm928_vm5, %vm929_vm4 }
 0x4f1   :  { %v925_v60 = vsub.f32 1.0, %v924_v57 }
 0x4f2   :  { %v903_v59 = vmul.f32 %v1196_v31, %v902_v58 }
 0x4f3   :  { %v926_v51 = vmul.f32 %v1198_v33, %v925_v60 }
 0x4f4   :  { %v904_v12 = vadd.f32 %v1196_v31, %v903_v59 }
 0x4f5   :  { %v927_v26 = vadd.f32 %v1198_v33, %v926_v51 }
 0x4f6   :  { %v908_v15 = vsel %vm907_vm2, %v1196_v31, %v904_v12 }
 0x4f7   :  { %v913_v23 = vsel %vm910_vm3, %v912_v10, %v908_v15  ;;  %v931_v44 = vsel %vm930_vm6, %v1198_v33, %v927_v26 }
 0x4f8   :  { %v938_v29 = vmul.f32 %v913_v23, %v893_v19  ;;  %v936_v0 = vsel %vm933_vm7, %v935_v45, %v931_v44 }
 0x4f9   :  { %v943_v1 = vsub.f32 1.0, %v936_v0  ;;  %v945_v4 = vmul.f32 %v936_v0, %v2010_v46 }
 0x4fa   :  { %v941_v40 = vadd.f32 %v939_v20, %v938_v29 }
 0x4fc   :  { %1199 = vtanh.f32 %v941_v40 }
 0x502   :  { %v1200_v2 = vpop.eup %1199 }
 0x503   :  { %v944_v3 = vmul.f32 %v1200_v2, %v943_v1 }
 0x505   :  { %v2020_v5 = vadd.f32 %v945_v4, %v944_v3 }
 0x507   :  { %947 = vst [vmem:[#allocation10 + $0x6] sm:$0x1] %v2020_v5  ;;  %968 = vmatmul.f32.vlgmr.msrb.gmra.mxu1 %v2020_v5  ;;  %988 = vmatmul.f32.vlgmr.msrb.gmra.mxu2 %v2020_v5 }
 0x508   :  { %1008 = vmatmul.f32.vlgmr.msrb.gmra.mxu3 %v2020_v5 }
 0x584   :  { %v969_v7 = vpop.f32.mrf.mxu1 }
 0x585   :  { %v970_v8 = vadd.f32 %v969_v7, %v2092_v35 }
 0x587   :  { %v1012_v39 = vadd.f32 %v970_v8, %v951_v6 }
 0x589   :  { %v1120_v52 = vmul.f32 -1.442695, %v1012_v39 }
 0x58a   :  { %v989_v55 = vpop.f32.mrf.mxu2 }
 0x58b   :  { %1201 = vpow2.f32 %v1120_v52  ;;  %v990_v48 = vadd.f32 %v989_v55, %v2093_v41  ;;  %v1009_v50 = vpop.f32.mrf.mxu3 }
 0x58c   :  { %v1010_v22 = vadd.f32 %v1009_v50, %v1712_v36 }
 0x58d   :  { %v1035_v54 = vadd.f32 %v1033_v63, %v990_v48 }
 0x58f   :  { %v1121_v56 = vmul.f32 -1.442695, %v1035_v54 }
 0x591   :  { %v1202_v42 = vpop.eup %1201  ;;  %1203 = vpow2.f32 %v1121_v56 }
 0x592   :  { %v1016_v43 = vadd.f32 1.0, %v1202_v42 }
 0x594   :  { %1205 = vrcp.f32 %v1016_v43  ;;  %v1028_v35 = vand.u32 2147483648, %v1016_v43  ;;  %v1026_v16 = vand.u32 2147483647, %v1016_v43  ;;  %vm1022_vm9 = vweird.f32 %v1016_v43 }
 0x596   :  { %v1029_v17 = vor.u32 1.1754944e-38, %v1028_v35  ;;  %vm1027_vm11 = vcmp.eq.f32.partialorder %v1026_v16, 8.507059e+37 }
 0x597   :  { %v1204_v61 = vpop.eup %1203 }
 0x598   :  { %v1039_v62 = vadd.f32 1.0, %v1204_v61 }
 0x59a   :  { %v1206_v47 = vpop.eup %1205  ;;  %1207 = vrcp.f32 %v1039_v62  ;;  %v1051_v28 = vand.u32 2147483648, %v1039_v62  ;;  %v1049_v31 = vand.u32 2147483647, %v1039_v62  ;;  %vm1045_vm13 = vweird.f32 %v1039_v62 }
 0x59b   :  { %v1018_v38 = vmul.f32 %v1206_v47, %v1016_v43  ;;  %vm1023_vm8 = vweird.f32 %v1206_v47 }
 0x59c   :  { %vm1024_vm10 = vmor %vm1022_vm9, %vm1023_vm8  ;;  %v1052_v57 = vor.u32 1.1754944e-38, %v1051_v28  ;;  %vm1050_vm15 = vcmp.eq.f32.partialorder %v1049_v31, 8.507059e+37 }
 0x59d   :  { %v1019_v46 = vsub.f32 1.0, %v1018_v38 }
 0x59f   :  { %v1020_v13 = vmul.f32 %v1206_v47, %v1019_v46 }
 0x5a0   :  { %v1208_v11 = vpop.eup %1207 }
 0x5a1   :  { %v1041_v14 = vmul.f32 %v1208_v11, %v1039_v62  ;;  %v1021_v41 = vadd.f32 %v1206_v47, %v1020_v13  ;;  %vm1046_vm12 = vweird.f32 %v1208_v11 }
 0x5a2   :  { %vm1047_vm14 = vmor %vm1045_vm13, %vm1046_vm12 }
 0x5a3   :  { %v1042_v21 = vsub.f32 1.0, %v1041_v14  ;;  %v1025_v24 = vsel %vm1024_vm10, %v1206_v47, %v1021_v41 }
 0x5a4   :  { %v1030_v25 = vsel %vm1027_vm11, %v1029_v17, %v1025_v24 }
 0x5a5   :  { %v1043_v27 = vmul.f32 %v1208_v11, %v1042_v21  ;;  %v1055_v30 = vmul.f32 %v1030_v25, %v1010_v22 }
 0x5a7   :  { %v1044_v33 = vadd.f32 %v1208_v11, %v1043_v27  ;;  %v1058_v34 = vadd.f32 %v1056_v18, %v1055_v30 }
 0x5a9   :  { %v1048_v58 = vsel %vm1047_vm14, %v1208_v11, %v1044_v33  ;;  %1209 = vtanh.f32 %v1058_v34 }
 0x5aa   :  { %v1053_v49 = vsel %vm1050_vm15, %v1052_v57, %v1048_v58 }
 0x5ab   :  { %v1060_v60 = vsub.f32 1.0, %v1053_v49  ;;  %v1062_v9 = vmul.f32 %v1053_v49, %v2020_v5 }
 0x5af   :  { %v1210_v59 = vpop.eup %1209 }
 0x5b0   :  { %v1061_v36 = vmul.f32 %v1210_v59, %v1060_v60 }
 0x5b2   :  { %v1063_v53 = vadd.f32 %v1062_v9, %v1061_v36 }
 0x5b4   :  { %1064 = vst [vmem:[#allocation10 + $0x7] sm:$0x1] %v1063_v53 }
 0x5b5   :  { %1075 = dma.vmem_to_hbm [thread:$0]  %s1071_s11, 128, %s1073_s1, [#allocation6]  }
 0x5b6   :  { %1373 = dma.done.wait [#allocation6], 128  }
 0x5b7   :  { %1374 = vsyncadd [#allocation6], 4294967168 }
 0x5b8   :  { %1080 = vsyncpa [#allocation5], 1 }
 0x5b9   :  { %1081 = vsyncpa [#allocation8], 1 }
 0x5ba   :  { %1082 = vsyncpa [#allocation6], 1 }

</bundles_post_ra>
